<compile_context>
chip_gen: v7x
topology: tpu7x:2x2x1
jax: 0.10.0
libtpu: 0.0.40
codegen_flags: <defaults>
</compile_context>

<pallas_src>
import functools

import jax
import jax.numpy as jnp
from jax.experimental import pallas as pl
from jax.experimental.pallas import tpu as pltpu

EPS = 1e-5
POOL = 4


# -------------------------------- fused kernel -------------------------------- #
def _tiny_resnet_kernel(p_ref, w1_ref, b1_ref, wblk_ref, bblk_ref, m_ref, pool_ref,
                        wl_ref, bl_ref, out_ref, src_ref, tap_ref,
                        *, n_layers, wp, mimg, cdim, npool, slack):
    """One grid step == one image.  Activations are channel-major (C, M) values."""
    f32 = jnp.float32
    # Hoisted interior mask (JAX doesn't CSE broadcast_in_dim -> broadcast once).
    mask = jnp.broadcast_to(m_ref[...], (cdim, mimg))

    # Zero the lane-slack shift buffer once; its interior is overwritten before
    # every read, so the slack (and pad-ring lanes, via mask) stay exactly zero.
    src_ref[...] = jnp.zeros_like(src_ref)

    # ---- stem: conv1(5x5, stride 3) as W1^T (C,K) @ patches (K,M) + folded BN, ReLU.
    a = jnp.dot(w1_ref[...], p_ref[0], preferred_element_type=f32) + b1_ref[...]
    a = mask * jnp.maximum(a, 0.0)

    offs = tuple((ky - 1) * wp + (kx - 1) for ky in range(3) for kx in range(3))
    inv_n = 1.0 / float(n_layers)

    def conv3x3(x, wt, b):
        # Stage the 9 shifted tap windows into a (9C, M) slab (static lane-offset
        # loads from the slack buffer, sublane-aligned stores), then ONE K=9C matmul
        # with the wide spatial dim on the MXU output/lane axis.
        src_ref[:, slack:slack + mimg] = x
        for t, off in enumerate(offs):
            s0 = slack + off
            tap_ref[t * cdim:(t + 1) * cdim, :] = src_ref[:, s0:s0 + mimg]
        return jnp.dot(wt, tap_ref[...], preferred_element_type=f32) + b

    for layer in range(n_layers):                        # unrolled, n_layers is small
        h = mask * jnp.maximum(conv3x3(a, wblk_ref[layer, 0], bblk_ref[layer, 0]), 0.0)
        f = mask * conv3x3(h, wblk_ref[layer, 1], bblk_ref[layer, 1])
        a = a + inv_n * f                                # Euler step: out += f(out)/n

    # ---- fused epilogue: avg_pool2d(.,4) + NCHW flatten + Linear -> (1, num_classes).
    pooled = jnp.dot(a, pool_ref[...], preferred_element_type=f32)       # (C, npool)
    logits = bl_ref[...]
    for c in range(cdim):                                # tiny, fully unrolled
        logits = logits + jnp.dot(pooled[c:c + 1, :], wl_ref[c],
                                  preferred_element_type=f32)            # (1,np)@(np,nc)
    out_ref[0] = logits


# --------------------------------- JAX glue ----------------------------------- #
def bn_fold(gamma, beta, mean, var):
    scale = gamma / jnp.sqrt(var + EPS)
    shift = beta - mean * scale
    return scale, shift


def _stem_patches(x_nhwc, kh, kw, stride, pad, k_pad):
    """Stem im2col, channel-major K, laid over the zero-padded output grid.

    Returns (B, k_pad, M) where M = (oh+2)*(ow+2); pad-ring lanes are zero.
    """
    B, H, W, Cin = x_nhwc.shape
    xp = jnp.pad(x_nhwc, ((0, 0), (pad, pad), (pad, pad), (0, 0)))
    oh = (H + 2 * pad - kh) // stride + 1
    ow = (W + 2 * pad - kw) // stride + 1
    taps = []
    for i in range(kh):
        for j in range(kw):
            taps.append(xp[:, i:i + stride * (oh - 1) + 1:stride,
                           j:j + stride * (ow - 1) + 1:stride, :])
    p = jnp.stack(taps, axis=3).reshape(B, oh, ow, kh * kw * Cin)   # (tap, cin) cols
    p = jnp.pad(p, ((0, 0), (1, 1), (1, 1), (0, k_pad - kh * kw * Cin)))
    p = p.reshape(B, (oh + 2) * (ow + 2), k_pad)
    return jnp.transpose(p, (0, 2, 1))


def _grid_constants(oh, ow):
    """Interior mask (1, M) and per-image avg-pool matrix (M, ph*pw)."""
    hp, wp = oh + 2, ow + 2
    m = hp * wp
    ph, pw = oh // POOL, ow // POOL
    j = jnp.arange(m)
    y = j // wp - 1                       # output-pixel row (-1 / oh => pad ring)
    x = j % wp - 1
    interior = (y >= 0) & (y < oh) & (x >= 0) & (x < ow)
    mask = interior.astype(jnp.float32).reshape(1, m)
    q = jnp.arange(ph * pw)
    py, px = q // pw, q % pw
    win = ((y[:, None] >= POOL * py[None, :]) & (y[:, None] < POOL * py[None, :] + POOL)
           & (x[:, None] >= POOL * px[None, :]) & (x[:, None] < POOL * px[None, :] + POOL)
           & interior[:, None])
    pool = win.astype(jnp.float32) / float(POOL * POOL)             # (M, ph*pw)
    return mask, pool, ph, pw


def _fold_params(params, k_pad):
    """Fold inference-mode BN into conv weights/biases; reshape for the kernel."""
    C = params['conv1_w'].shape[-1]
    s1, t1 = params['bn1']
    w1 = (params['conv1_w'] * s1).reshape(-1, C)                    # (75, C); no conv bias
    w1 = jnp.pad(w1, ((0, k_pad - w1.shape[0]), (0, 0)))
    w1t = w1.T                                                      # (C, k_pad)
    b1 = t1.reshape(C, 1)
    wts, bs = [], []
    for blk in params['blocks']:
        sa, ta = blk['bn1']
        sb, tb = blk['bn2']
        wts.append(jnp.stack([(blk['conv1_w'] * sa).reshape(9 * C, C).T,
                              (blk['conv2_w'] * sb).reshape(9 * C, C).T]))    # (2, C, 9C)
        bs.append(jnp.stack([(blk['conv1_b'] * sa + ta).reshape(C, 1),
                             (blk['conv2_b'] * sb + tb).reshape(C, 1)]))      # (2, C, 1)
    return w1t, b1, jnp.stack(wts), jnp.stack(bs)


# -------------------------------- parameter init ------------------------------- #
def init_params(key, in_planes, n_layers, num_classes):
    ks = iter(jax.random.split(key, 64))

    def conv_w(kh, kw, cin, cout):
        fan_in = kh * kw * cin
        return jax.random.normal(next(ks), (kh, kw, cin, cout), jnp.float32) / jnp.sqrt(fan_in)

    def bn(c):
        gamma = 1.0 + 0.1 * jax.random.normal(next(ks), (c,), jnp.float32)
        beta = 0.1 * jax.random.normal(next(ks), (c,), jnp.float32)
        mean = 0.1 * jax.random.normal(next(ks), (c,), jnp.float32)
        var = 1.0 + 0.1 * jax.random.uniform(next(ks), (c,), jnp.float32)
        return bn_fold(gamma, beta, mean, var)

    params = {'conv1_w': conv_w(5, 5, 3, in_planes), 'bn1': bn(in_planes), 'blocks': []}
    for _ in range(n_layers):
        params['blocks'].append({
            'conv1_w': conv_w(3, 3, in_planes, in_planes),
            'conv1_b': 0.1 * jax.random.normal(next(ks), (in_planes,), jnp.float32),
            'bn1': bn(in_planes),
            'conv2_w': conv_w(3, 3, in_planes, in_planes),
            'conv2_b': 0.1 * jax.random.normal(next(ks), (in_planes,), jnp.float32),
            'bn2': bn(in_planes),
        })
    params['linear_w'] = (jax.random.normal(next(ks), (4 * in_planes, num_classes), jnp.float32)
                          / jnp.sqrt(4 * in_planes))
    params['linear_b'] = 0.1 * jax.random.normal(next(ks), (num_classes,), jnp.float32)
    return params


# --------------------------------- forward pass -------------------------------- #
def tiny_resnet_forward(x_nchw, params, n_layers):
    x = jnp.transpose(x_nchw, (0, 2, 3, 1)).astype(jnp.float32)     # NCHW -> NHWC
    B, H, W, cin = x.shape
    C = params['conv1_w'].shape[-1]
    nc = params['linear_w'].shape[-1]
    oh = (H + 2 * 1 - 5) // 3 + 1                                   # stem: 5x5, s=3, p=1
    ow = (W + 2 * 1 - 5) // 3 + 1
    wp = ow + 2
    mimg = (oh + 2) * (ow + 2)
    k_pad = -(-(5 * 5 * cin) // 8) * 8                              # sublane-align stem K
    slack = 16                                                      # >= wp + 1
    assert slack >= wp + 1

    # TODO(synk): stem im2col (25 strided slices) stays in the XLA wrapper; a fully
    # in-kernel stride-3 gather would need lane-strided loads Mosaic doesn't expose cleanly.
    patches = _stem_patches(x, 5, 5, 3, 1, k_pad)                   # (B, k_pad, M)
    mask, pool, ph, pw = _grid_constants(oh, ow)                    # (1, M), (M, npool)
    npool = ph * pw
    assert npool * C == params['linear_w'].shape[0]
    w1t, b1, wblk, bblk = _fold_params(params, k_pad)
    wl = params['linear_w'].reshape(C, npool, nc)                   # NCHW flatten order
    bl = params['linear_b'].reshape(1, nc)

    kernel = functools.partial(_tiny_resnet_kernel, n_layers=n_layers, wp=wp,
                               mimg=mimg, cdim=C, npool=npool, slack=slack)
    out = pl.pallas_call(
        kernel,
        out_shape=jax.ShapeDtypeStruct((B, 1, nc), jnp.float32),
        grid=(B,),                                                  # one image per grid step
        in_specs=[
            pl.BlockSpec((1, k_pad, mimg), lambda b: (b, 0, 0)),            # stem patches
            pl.BlockSpec((C, k_pad), lambda b: (0, 0)),                     # stem W^T (BN folded)
            pl.BlockSpec((C, 1), lambda b: (0, 0)),                         # stem bias
            pl.BlockSpec((n_layers, 2, C, 9 * C), lambda b: (0, 0, 0, 0)),  # block W^T slabs
            pl.BlockSpec((n_layers, 2, C, 1), lambda b: (0, 0, 0, 0)),      # block biases
            pl.BlockSpec((1, mimg), lambda b: (0, 0)),                      # interior mask
            pl.BlockSpec((mimg, npool), lambda b: (0, 0)),                  # per-image pool matrix
            pl.BlockSpec((C, npool, nc), lambda b: (0, 0, 0)),              # linear W (pooled layout)
            pl.BlockSpec((1, nc), lambda b: (0, 0)),                        # linear bias
        ],
        out_specs=pl.BlockSpec((1, 1, nc), lambda b: (b, 0, 0)),
        scratch_shapes=[pltpu.VMEM((C, mimg + 2 * slack), jnp.float32),     # lane-slack shift buf
                        pltpu.VMEM((9 * C, mimg), jnp.float32)],            # stacked 9-tap slab
        compiler_params=pltpu.CompilerParams(dimension_semantics=("parallel",)),
    )(patches, w1t, b1, wblk, bblk, mask, pool, wl, bl)
    return out.reshape(B, nc)                                       # free view reshape


# ------------------------------- pure-JAX reference ----------------------------- #
def tiny_resnet_reference(x_nchw, params, n_layers):
    x = jnp.transpose(x_nchw, (0, 2, 3, 1)).astype(jnp.float32)

    def conv(h, w, stride, pad):
        return jax.lax.conv_general_dilated(
            h, w, (stride, stride), [(pad, pad), (pad, pad)],
            dimension_numbers=('NHWC', 'HWIO', 'NHWC'),
            precision=jax.lax.Precision.HIGHEST)

    s1, t1 = params['bn1']
    out = jnp.maximum(conv(x, params['conv1_w'], 3, 1) * s1 + t1, 0.0)
    for blk in params['blocks']:
        sa, ta = blk['bn1']
        h = jnp.maximum((conv(out, blk['conv1_w'], 1, 1) + blk['conv1_b']) * sa + ta, 0.0)
        sb, tb = blk['bn2']
        f = (conv(h, blk['conv2_w'], 1, 1) + blk['conv2_b']) * sb + tb
        out = out + f / n_layers
    B, H, W, C = out.shape
    ph, pw = H // POOL, W // POOL
    pooled = out[:, :POOL * ph, :POOL * pw, :].reshape(B, ph, POOL, pw, POOL, C).mean(axis=(2, 4))
    feat = jnp.transpose(pooled, (0, 3, 1, 2)).reshape(B, -1)
    return jnp.dot(feat, params['linear_w'],
                   precision=jax.lax.Precision.HIGHEST) + params['linear_b']


# ------------------------------------- main ------------------------------------- #
if __name__ == "__main__":
    in_planes, n_layers, num_classes = 8, 2, 10
    key = jax.random.PRNGKey(0)
    k_param, k_x = jax.random.split(key)
    params = init_params(k_param, in_planes, n_layers, num_classes)
    # NCHW like the PyTorch module; 32x32 so conv1(stride 3) -> 10x10, avg_pool(4)
    # -> 2x2, giving the 4*in_planes features the Linear expects.
    x = jax.random.normal(k_x, (2, 3, 32, 32), jnp.float32)

    fwd = jax.jit(functools.partial(tiny_resnet_forward, n_layers=n_layers))
    logits = jax.block_until_ready(fwd(x, params))

    ref = tiny_resnet_reference(x, params, n_layers)
    assert logits.shape == (2, num_classes)
    assert jnp.allclose(logits, ref, atol=1e-2, rtol=1e-2)
    print("KERNEL_OK")
</pallas_src>

<mosaic_0001>
module attributes {stable_mosaic.version = 11 : i64} {
  func.func @_tiny_resnet_kernel(%arg0: i32, %arg1: memref<1x80x144xf32, #tpu.memory_space<vmem>>, %arg2: memref<8x80xf32, #tpu.memory_space<vmem>>, %arg3: memref<8x1xf32, #tpu.memory_space<vmem>>, %arg4: memref<2x2x8x72xf32, #tpu.memory_space<vmem>>, %arg5: memref<2x2x8x1xf32, #tpu.memory_space<vmem>>, %arg6: memref<1x144xf32, #tpu.memory_space<vmem>>, %arg7: memref<144x4xf32, #tpu.memory_space<vmem>>, %arg8: memref<8x4x10xf32, #tpu.memory_space<vmem>>, %arg9: memref<1x10xf32, #tpu.memory_space<vmem>>, %arg10: memref<1x1x10xf32, #tpu.memory_space<vmem>>, %arg11: memref<8x176xf32, #tpu.memory_space<vmem>>, %arg12: memref<72x144xf32, #tpu.memory_space<vmem>>) attributes {dimension_semantics = [#tpu.dimension_semantics<parallel>], iteration_bounds = array<i64: 2>, scalar_prefetch = 0 : i64, scratch_operands = 2 : i64, tpu.core_type = #tpu.core_type<tc>, window_params = [{transform_indices = @transform_0, window_bounds = array<i64: 1, 80, 144>}, {pipeline_mode = #tpu.pipeline_mode<synchronous>, transform_indices = @transform_1, window_bounds = array<i64: 8, 80>}, {pipeline_mode = #tpu.pipeline_mode<synchronous>, transform_indices = @transform_2, window_bounds = array<i64: 8, 1>}, {pipeline_mode = #tpu.pipeline_mode<synchronous>, transform_indices = @transform_3, window_bounds = array<i64: 2, 2, 8, 72>}, {pipeline_mode = #tpu.pipeline_mode<synchronous>, transform_indices = @transform_4, window_bounds = array<i64: 2, 2, 8, 1>}, {pipeline_mode = #tpu.pipeline_mode<synchronous>, transform_indices = @transform_5, window_bounds = array<i64: 1, 144>}, {pipeline_mode = #tpu.pipeline_mode<synchronous>, transform_indices = @transform_6, window_bounds = array<i64: 144, 4>}, {pipeline_mode = #tpu.pipeline_mode<synchronous>, transform_indices = @transform_7, window_bounds = array<i64: 8, 4, 10>}, {pipeline_mode = #tpu.pipeline_mode<synchronous>, transform_indices = @transform_8, window_bounds = array<i64: 1, 10>}, {transform_indices = @transform_9, window_bounds = array<i64: 1, 1, 10>}]} {
    %c0 = arith.constant 0 : index
    %c0_0 = arith.constant 0 : index
    %0 = vector.load %arg6[%c0, %c0_0] : memref<1x144xf32, #tpu.memory_space<vmem>>, vector<1x144xf32>
    %1 = vector.shape_cast %0 : vector<1x144xf32> to vector<1x144xf32>
    %2 = vector.broadcast %1 : vector<1x144xf32> to vector<8x144xf32>
    %cst = arith.constant 0.000000e+00 : f32
    %3 = vector.broadcast %cst : f32 to vector<8x176xf32>
    %c0_1 = arith.constant 0 : index
    %c0_2 = arith.constant 0 : index
    %4 = vector.load %arg11[%c0_1, %c0_2] : memref<8x176xf32, #tpu.memory_space<vmem>>, vector<8x176xf32>
    tpu.vector_store %arg11[%c0_1, %c0_2], %3 {strides = array<i32>} : memref<8x176xf32, #tpu.memory_space<vmem>>, vector<8x176xf32>,
    %c0_3 = arith.constant 0 : index
    %c0_4 = arith.constant 0 : index
    %5 = vector.load %arg2[%c0_3, %c0_4] : memref<8x80xf32, #tpu.memory_space<vmem>>, vector<8x80xf32>
    %c0_5 = arith.constant 0 : index
    %c0_6 = arith.constant 0 : index
    %c0_7 = arith.constant 0 : index
    %6 = vector.load %arg1[%c0_5, %c0_6, %c0_7] : memref<1x80x144xf32, #tpu.memory_space<vmem>>, vector<1x80x144xf32>
    %7 = vector.shape_cast %6 : vector<1x80x144xf32> to vector<80x144xf32>
    %cst_8 = arith.constant dense<0.000000e+00> : vector<8x144xf32>
    %8 = tpu.matmul %5, %7, %cst_8 {dimension_numbers = #tpu.dot_dimension_numbers<[1], [0], [0], [1], [0, 0, 1, 1], [], []>} : vector<8x80xf32>, vector<80x144xf32>, vector<8x144xf32> -> vector<8x144xf32>
    %c0_9 = arith.constant 0 : index
    %c0_10 = arith.constant 0 : index
    %9 = vector.load %arg3[%c0_9, %c0_10] : memref<8x1xf32, #tpu.memory_space<vmem>>, vector<8x1xf32>
    %10 = vector.broadcast %9 : vector<8x1xf32> to vector<8x144xf32>
    %11 = arith.addf %8, %10 : vector<8x144xf32>
    %cst_11 = arith.constant 0.000000e+00 : f32
    %12 = vector.broadcast %cst_11 : f32 to vector<8x144xf32>
    %13 = arith.maximumf %11, %12 : vector<8x144xf32>
    %14 = arith.mulf %2, %13 : vector<8x144xf32>
    %c0_12 = arith.constant 0 : index
    %c0_13 = arith.constant 0 : index
    %c0_14 = arith.constant 0 : index
    %c0_15 = arith.constant 0 : index
    %15 = vector.load %arg4[%c0_12, %c0_13, %c0_14, %c0_15] : memref<2x2x8x72xf32, #tpu.memory_space<vmem>>, vector<1x1x8x72xf32>
    %16 = vector.shape_cast %15 : vector<1x1x8x72xf32> to vector<8x72xf32>
    %c0_16 = arith.constant 0 : index
    %c0_17 = arith.constant 0 : index
    %c0_18 = arith.constant 0 : index
    %c0_19 = arith.constant 0 : index
    %17 = vector.load %arg5[%c0_16, %c0_17, %c0_18, %c0_19] : memref<2x2x8x1xf32, #tpu.memory_space<vmem>>, vector<1x1x8x1xf32>
    %18 = vector.shape_cast %17 : vector<1x1x8x1xf32> to vector<8x1xf32>
    %c0_20 = arith.constant 0 : index
    %c16 = arith.constant 16 : index
    %19 = vector.load %arg11[%c0_20, %c16] : memref<8x176xf32, #tpu.memory_space<vmem>>, vector<8x144xf32>
    tpu.vector_store %arg11[%c0_20, %c16], %14 {strides = array<i32>} : memref<8x176xf32, #tpu.memory_space<vmem>>, vector<8x144xf32>,
    %c0_21 = arith.constant 0 : index
    %c3 = arith.constant 3 : index
    %20 = vector.load %arg11[%c0_21, %c3] : memref<8x176xf32, #tpu.memory_space<vmem>>, vector<8x144xf32>
    %c0_22 = arith.constant 0 : index
    %c0_23 = arith.constant 0 : index
    %21 = vector.load %arg12[%c0_22, %c0_23] : memref<72x144xf32, #tpu.memory_space<vmem>>, vector<8x144xf32>
    tpu.vector_store %arg12[%c0_22, %c0_23], %20 {strides = array<i32>} : memref<72x144xf32, #tpu.memory_space<vmem>>, vector<8x144xf32>,
    %c0_24 = arith.constant 0 : index
    %c4 = arith.constant 4 : index
    %22 = vector.load %arg11[%c0_24, %c4] : memref<8x176xf32, #tpu.memory_space<vmem>>, vector<8x144xf32>
    %c8 = arith.constant 8 : index
    %c0_25 = arith.constant 0 : index
    %23 = vector.load %arg12[%c8, %c0_25] : memref<72x144xf32, #tpu.memory_space<vmem>>, vector<8x144xf32>
    tpu.vector_store %arg12[%c8, %c0_25], %22 {strides = array<i32>} : memref<72x144xf32, #tpu.memory_space<vmem>>, vector<8x144xf32>,
    %c0_26 = arith.constant 0 : index
    %c5 = arith.constant 5 : index
    %24 = vector.load %arg11[%c0_26, %c5] : memref<8x176xf32, #tpu.memory_space<vmem>>, vector<8x144xf32>
    %c16_27 = arith.constant 16 : index
    %c0_28 = arith.constant 0 : index
    %25 = vector.load %arg12[%c16_27, %c0_28] : memref<72x144xf32, #tpu.memory_space<vmem>>, vector<8x144xf32>
    tpu.vector_store %arg12[%c16_27, %c0_28], %24 {strides = array<i32>} : memref<72x144xf32, #tpu.memory_space<vmem>>, vector<8x144xf32>,
    %c0_29 = arith.constant 0 : index
    %c15 = arith.constant 15 : index
    %26 = vector.load %arg11[%c0_29, %c15] : memref<8x176xf32, #tpu.memory_space<vmem>>, vector<8x144xf32>
    %c24 = arith.constant 24 : index
    %c0_30 = arith.constant 0 : index
    %27 = vector.load %arg12[%c24, %c0_30] : memref<72x144xf32, #tpu.memory_space<vmem>>, vector<8x144xf32>
    tpu.vector_store %arg12[%c24, %c0_30], %26 {strides = array<i32>} : memref<72x144xf32, #tpu.memory_space<vmem>>, vector<8x144xf32>,
    %c0_31 = arith.constant 0 : index
    %c16_32 = arith.constant 16 : index
    %28 = vector.load %arg11[%c0_31, %c16_32] : memref<8x176xf32, #tpu.memory_space<vmem>>, vector<8x144xf32>
    %c32 = arith.constant 32 : index
    %c0_33 = arith.constant 0 : index
    %29 = vector.load %arg12[%c32, %c0_33] : memref<72x144xf32, #tpu.memory_space<vmem>>, vector<8x144xf32>
    tpu.vector_store %arg12[%c32, %c0_33], %28 {strides = array<i32>} : memref<72x144xf32, #tpu.memory_space<vmem>>, vector<8x144xf32>,
    %c0_34 = arith.constant 0 : index
    %c17 = arith.constant 17 : index
    %30 = vector.load %arg11[%c0_34, %c17] : memref<8x176xf32, #tpu.memory_space<vmem>>, vector<8x144xf32>
    %c40 = arith.constant 40 : index
    %c0_35 = arith.constant 0 : index
    %31 = vector.load %arg12[%c40, %c0_35] : memref<72x144xf32, #tpu.memory_space<vmem>>, vector<8x144xf32>
    tpu.vector_store %arg12[%c40, %c0_35], %30 {strides = array<i32>} : memref<72x144xf32, #tpu.memory_space<vmem>>, vector<8x144xf32>,
    %c0_36 = arith.constant 0 : index
    %c27 = arith.constant 27 : index
    %32 = vector.load %arg11[%c0_36, %c27] : memref<8x176xf32, #tpu.memory_space<vmem>>, vector<8x144xf32>
    %c48 = arith.constant 48 : index
    %c0_37 = arith.constant 0 : index
    %33 = vector.load %arg12[%c48, %c0_37] : memref<72x144xf32, #tpu.memory_space<vmem>>, vector<8x144xf32>
    tpu.vector_store %arg12[%c48, %c0_37], %32 {strides = array<i32>} : memref<72x144xf32, #tpu.memory_space<vmem>>, vector<8x144xf32>,
    %c0_38 = arith.constant 0 : index
    %c28 = arith.constant 28 : index
    %34 = vector.load %arg11[%c0_38, %c28] : memref<8x176xf32, #tpu.memory_space<vmem>>, vector<8x144xf32>
    %c56 = arith.constant 56 : index
    %c0_39 = arith.constant 0 : index
    %35 = vector.load %arg12[%c56, %c0_39] : memref<72x144xf32, #tpu.memory_space<vmem>>, vector<8x144xf32>
    tpu.vector_store %arg12[%c56, %c0_39], %34 {strides = array<i32>} : memref<72x144xf32, #tpu.memory_space<vmem>>, vector<8x144xf32>,
    %c0_40 = arith.constant 0 : index
    %c29 = arith.constant 29 : index
    %36 = vector.load %arg11[%c0_40, %c29] : memref<8x176xf32, #tpu.memory_space<vmem>>, vector<8x144xf32>
    %c64 = arith.constant 64 : index
    %c0_41 = arith.constant 0 : index
    %37 = vector.load %arg12[%c64, %c0_41] : memref<72x144xf32, #tpu.memory_space<vmem>>, vector<8x144xf32>
    tpu.vector_store %arg12[%c64, %c0_41], %36 {strides = array<i32>} : memref<72x144xf32, #tpu.memory_space<vmem>>, vector<8x144xf32>,
    %c0_42 = arith.constant 0 : index
    %c0_43 = arith.constant 0 : index
    %38 = vector.load %arg12[%c0_42, %c0_43] : memref<72x144xf32, #tpu.memory_space<vmem>>, vector<72x144xf32>
    %cst_44 = arith.constant dense<0.000000e+00> : vector<8x144xf32>
    %39 = tpu.matmul %16, %38, %cst_44 {dimension_numbers = #tpu.dot_dimension_numbers<[1], [0], [0], [1], [0, 0, 1, 1], [], []>} : vector<8x72xf32>, vector<72x144xf32>, vector<8x144xf32> -> vector<8x144xf32>
    %40 = vector.broadcast %18 : vector<8x1xf32> to vector<8x144xf32>
    %41 = arith.addf %39, %40 : vector<8x144xf32>
    %cst_45 = arith.constant 0.000000e+00 : f32
    %42 = vector.broadcast %cst_45 : f32 to vector<8x144xf32>
    %43 = arith.maximumf %41, %42 : vector<8x144xf32>
    %44 = arith.mulf %2, %43 : vector<8x144xf32>
    %c0_46 = arith.constant 0 : index
    %c1 = arith.constant 1 : index
    %c0_47 = arith.constant 0 : index
    %c0_48 = arith.constant 0 : index
    %45 = vector.load %arg4[%c0_46, %c1, %c0_47, %c0_48] : memref<2x2x8x72xf32, #tpu.memory_space<vmem>>, vector<1x1x8x72xf32>
    %46 = vector.shape_cast %45 : vector<1x1x8x72xf32> to vector<8x72xf32>
    %c0_49 = arith.constant 0 : index
    %c1_50 = arith.constant 1 : index
    %c0_51 = arith.constant 0 : index
    %c0_52 = arith.constant 0 : index
    %47 = vector.load %arg5[%c0_49, %c1_50, %c0_51, %c0_52] : memref<2x2x8x1xf32, #tpu.memory_space<vmem>>, vector<1x1x8x1xf32>
    %48 = vector.shape_cast %47 : vector<1x1x8x1xf32> to vector<8x1xf32>
    %c0_53 = arith.constant 0 : index
    %c16_54 = arith.constant 16 : index
    %49 = vector.load %arg11[%c0_53, %c16_54] : memref<8x176xf32, #tpu.memory_space<vmem>>, vector<8x144xf32>
    tpu.vector_store %arg11[%c0_53, %c16_54], %44 {strides = array<i32>} : memref<8x176xf32, #tpu.memory_space<vmem>>, vector<8x144xf32>,
    %c0_55 = arith.constant 0 : index
    %c3_56 = arith.constant 3 : index
    %50 = vector.load %arg11[%c0_55, %c3_56] : memref<8x176xf32, #tpu.memory_space<vmem>>, vector<8x144xf32>
    %c0_57 = arith.constant 0 : index
    %c0_58 = arith.constant 0 : index
    %51 = vector.load %arg12[%c0_57, %c0_58] : memref<72x144xf32, #tpu.memory_space<vmem>>, vector<8x144xf32>
    tpu.vector_store %arg12[%c0_57, %c0_58], %50 {strides = array<i32>} : memref<72x144xf32, #tpu.memory_space<vmem>>, vector<8x144xf32>,
    %c0_59 = arith.constant 0 : index
    %c4_60 = arith.constant 4 : index
    %52 = vector.load %arg11[%c0_59, %c4_60] : memref<8x176xf32, #tpu.memory_space<vmem>>, vector<8x144xf32>
    %c8_61 = arith.constant 8 : index
    %c0_62 = arith.constant 0 : index
    %53 = vector.load %arg12[%c8_61, %c0_62] : memref<72x144xf32, #tpu.memory_space<vmem>>, vector<8x144xf32>
    tpu.vector_store %arg12[%c8_61, %c0_62], %52 {strides = array<i32>} : memref<72x144xf32, #tpu.memory_space<vmem>>, vector<8x144xf32>,
    %c0_63 = arith.constant 0 : index
    %c5_64 = arith.constant 5 : index
    %54 = vector.load %arg11[%c0_63, %c5_64] : memref<8x176xf32, #tpu.memory_space<vmem>>, vector<8x144xf32>
    %c16_65 = arith.constant 16 : index
    %c0_66 = arith.constant 0 : index
    %55 = vector.load %arg12[%c16_65, %c0_66] : memref<72x144xf32, #tpu.memory_space<vmem>>, vector<8x144xf32>
    tpu.vector_store %arg12[%c16_65, %c0_66], %54 {strides = array<i32>} : memref<72x144xf32, #tpu.memory_space<vmem>>, vector<8x144xf32>,
    %c0_67 = arith.constant 0 : index
    %c15_68 = arith.constant 15 : index
    %56 = vector.load %arg11[%c0_67, %c15_68] : memref<8x176xf32, #tpu.memory_space<vmem>>, vector<8x144xf32>
    %c24_69 = arith.constant 24 : index
    %c0_70 = arith.constant 0 : index
    %57 = vector.load %arg12[%c24_69, %c0_70] : memref<72x144xf32, #tpu.memory_space<vmem>>, vector<8x144xf32>
    tpu.vector_store %arg12[%c24_69, %c0_70], %56 {strides = array<i32>} : memref<72x144xf32, #tpu.memory_space<vmem>>, vector<8x144xf32>,
    %c0_71 = arith.constant 0 : index
    %c16_72 = arith.constant 16 : index
    %58 = vector.load %arg11[%c0_71, %c16_72] : memref<8x176xf32, #tpu.memory_space<vmem>>, vector<8x144xf32>
    %c32_73 = arith.constant 32 : index
    %c0_74 = arith.constant 0 : index
    %59 = vector.load %arg12[%c32_73, %c0_74] : memref<72x144xf32, #tpu.memory_space<vmem>>, vector<8x144xf32>
    tpu.vector_store %arg12[%c32_73, %c0_74], %58 {strides = array<i32>} : memref<72x144xf32, #tpu.memory_space<vmem>>, vector<8x144xf32>,
    %c0_75 = arith.constant 0 : index
    %c17_76 = arith.constant 17 : index
    %60 = vector.load %arg11[%c0_75, %c17_76] : memref<8x176xf32, #tpu.memory_space<vmem>>, vector<8x144xf32>
    %c40_77 = arith.constant 40 : index
    %c0_78 = arith.constant 0 : index
    %61 = vector.load %arg12[%c40_77, %c0_78] : memref<72x144xf32, #tpu.memory_space<vmem>>, vector<8x144xf32>
    tpu.vector_store %arg12[%c40_77, %c0_78], %60 {strides = array<i32>} : memref<72x144xf32, #tpu.memory_space<vmem>>, vector<8x144xf32>,
    %c0_79 = arith.constant 0 : index
    %c27_80 = arith.constant 27 : index
    %62 = vector.load %arg11[%c0_79, %c27_80] : memref<8x176xf32, #tpu.memory_space<vmem>>, vector<8x144xf32>
    %c48_81 = arith.constant 48 : index
    %c0_82 = arith.constant 0 : index
    %63 = vector.load %arg12[%c48_81, %c0_82] : memref<72x144xf32, #tpu.memory_space<vmem>>, vector<8x144xf32>
    tpu.vector_store %arg12[%c48_81, %c0_82], %62 {strides = array<i32>} : memref<72x144xf32, #tpu.memory_space<vmem>>, vector<8x144xf32>,
    %c0_83 = arith.constant 0 : index
    %c28_84 = arith.constant 28 : index
    %64 = vector.load %arg11[%c0_83, %c28_84] : memref<8x176xf32, #tpu.memory_space<vmem>>, vector<8x144xf32>
    %c56_85 = arith.constant 56 : index
    %c0_86 = arith.constant 0 : index
    %65 = vector.load %arg12[%c56_85, %c0_86] : memref<72x144xf32, #tpu.memory_space<vmem>>, vector<8x144xf32>
    tpu.vector_store %arg12[%c56_85, %c0_86], %64 {strides = array<i32>} : memref<72x144xf32, #tpu.memory_space<vmem>>, vector<8x144xf32>,
    %c0_87 = arith.constant 0 : index
    %c29_88 = arith.constant 29 : index
    %66 = vector.load %arg11[%c0_87, %c29_88] : memref<8x176xf32, #tpu.memory_space<vmem>>, vector<8x144xf32>
    %c64_89 = arith.constant 64 : index
    %c0_90 = arith.constant 0 : index
    %67 = vector.load %arg12[%c64_89, %c0_90] : memref<72x144xf32, #tpu.memory_space<vmem>>, vector<8x144xf32>
    tpu.vector_store %arg12[%c64_89, %c0_90], %66 {strides = array<i32>} : memref<72x144xf32, #tpu.memory_space<vmem>>, vector<8x144xf32>,
    %c0_91 = arith.constant 0 : index
    %c0_92 = arith.constant 0 : index
    %68 = vector.load %arg12[%c0_91, %c0_92] : memref<72x144xf32, #tpu.memory_space<vmem>>, vector<72x144xf32>
    %cst_93 = arith.constant dense<0.000000e+00> : vector<8x144xf32>
    %69 = tpu.matmul %46, %68, %cst_93 {dimension_numbers = #tpu.dot_dimension_numbers<[1], [0], [0], [1], [0, 0, 1, 1], [], []>} : vector<8x72xf32>, vector<72x144xf32>, vector<8x144xf32> -> vector<8x144xf32>
    %70 = vector.broadcast %48 : vector<8x1xf32> to vector<8x144xf32>
    %71 = arith.addf %69, %70 : vector<8x144xf32>
    %72 = arith.mulf %2, %71 : vector<8x144xf32>
    %cst_94 = arith.constant 5.000000e-01 : f32
    %73 = vector.broadcast %cst_94 : f32 to vector<8x144xf32>
    %74 = arith.mulf %73, %72 : vector<8x144xf32>
    %75 = arith.addf %14, %74 : vector<8x144xf32>
    %c1_95 = arith.constant 1 : index
    %c0_96 = arith.constant 0 : index
    %c0_97 = arith.constant 0 : index
    %c0_98 = arith.constant 0 : index
    %76 = vector.load %arg4[%c1_95, %c0_96, %c0_97, %c0_98] : memref<2x2x8x72xf32, #tpu.memory_space<vmem>>, vector<1x1x8x72xf32>
    %77 = vector.shape_cast %76 : vector<1x1x8x72xf32> to vector<8x72xf32>
    %c1_99 = arith.constant 1 : index
    %c0_100 = arith.constant 0 : index
    %c0_101 = arith.constant 0 : index
    %c0_102 = arith.constant 0 : index
    %78 = vector.load %arg5[%c1_99, %c0_100, %c0_101, %c0_102] : memref<2x2x8x1xf32, #tpu.memory_space<vmem>>, vector<1x1x8x1xf32>
    %79 = vector.shape_cast %78 : vector<1x1x8x1xf32> to vector<8x1xf32>
    %c0_103 = arith.constant 0 : index
    %c16_104 = arith.constant 16 : index
    %80 = vector.load %arg11[%c0_103, %c16_104] : memref<8x176xf32, #tpu.memory_space<vmem>>, vector<8x144xf32>
    tpu.vector_store %arg11[%c0_103, %c16_104], %75 {strides = array<i32>} : memref<8x176xf32, #tpu.memory_space<vmem>>, vector<8x144xf32>,
    %c0_105 = arith.constant 0 : index
    %c3_106 = arith.constant 3 : index
    %81 = vector.load %arg11[%c0_105, %c3_106] : memref<8x176xf32, #tpu.memory_space<vmem>>, vector<8x144xf32>
    %c0_107 = arith.constant 0 : index
    %c0_108 = arith.constant 0 : index
    %82 = vector.load %arg12[%c0_107, %c0_108] : memref<72x144xf32, #tpu.memory_space<vmem>>, vector<8x144xf32>
    tpu.vector_store %arg12[%c0_107, %c0_108], %81 {strides = array<i32>} : memref<72x144xf32, #tpu.memory_space<vmem>>, vector<8x144xf32>,
    %c0_109 = arith.constant 0 : index
    %c4_110 = arith.constant 4 : index
    %83 = vector.load %arg11[%c0_109, %c4_110] : memref<8x176xf32, #tpu.memory_space<vmem>>, vector<8x144xf32>
    %c8_111 = arith.constant 8 : index
    %c0_112 = arith.constant 0 : index
    %84 = vector.load %arg12[%c8_111, %c0_112] : memref<72x144xf32, #tpu.memory_space<vmem>>, vector<8x144xf32>
    tpu.vector_store %arg12[%c8_111, %c0_112], %83 {strides = array<i32>} : memref<72x144xf32, #tpu.memory_space<vmem>>, vector<8x144xf32>,
    %c0_113 = arith.constant 0 : index
    %c5_114 = arith.constant 5 : index
    %85 = vector.load %arg11[%c0_113, %c5_114] : memref<8x176xf32, #tpu.memory_space<vmem>>, vector<8x144xf32>
    %c16_115 = arith.constant 16 : index
    %c0_116 = arith.constant 0 : index
    %86 = vector.load %arg12[%c16_115, %c0_116] : memref<72x144xf32, #tpu.memory_space<vmem>>, vector<8x144xf32>
    tpu.vector_store %arg12[%c16_115, %c0_116], %85 {strides = array<i32>} : memref<72x144xf32, #tpu.memory_space<vmem>>, vector<8x144xf32>,
    %c0_117 = arith.constant 0 : index
    %c15_118 = arith.constant 15 : index
    %87 = vector.load %arg11[%c0_117, %c15_118] : memref<8x176xf32, #tpu.memory_space<vmem>>, vector<8x144xf32>
    %c24_119 = arith.constant 24 : index
    %c0_120 = arith.constant 0 : index
    %88 = vector.load %arg12[%c24_119, %c0_120] : memref<72x144xf32, #tpu.memory_space<vmem>>, vector<8x144xf32>
    tpu.vector_store %arg12[%c24_119, %c0_120], %87 {strides = array<i32>} : memref<72x144xf32, #tpu.memory_space<vmem>>, vector<8x144xf32>,
    %c0_121 = arith.constant 0 : index
    %c16_122 = arith.constant 16 : index
    %89 = vector.load %arg11[%c0_121, %c16_122] : memref<8x176xf32, #tpu.memory_space<vmem>>, vector<8x144xf32>
    %c32_123 = arith.constant 32 : index
    %c0_124 = arith.constant 0 : index
    %90 = vector.load %arg12[%c32_123, %c0_124] : memref<72x144xf32, #tpu.memory_space<vmem>>, vector<8x144xf32>
    tpu.vector_store %arg12[%c32_123, %c0_124], %89 {strides = array<i32>} : memref<72x144xf32, #tpu.memory_space<vmem>>, vector<8x144xf32>,
    %c0_125 = arith.constant 0 : index
    %c17_126 = arith.constant 17 : index
    %91 = vector.load %arg11[%c0_125, %c17_126] : memref<8x176xf32, #tpu.memory_space<vmem>>, vector<8x144xf32>
    %c40_127 = arith.constant 40 : index
    %c0_128 = arith.constant 0 : index
    %92 = vector.load %arg12[%c40_127, %c0_128] : memref<72x144xf32, #tpu.memory_space<vmem>>, vector<8x144xf32>
    tpu.vector_store %arg12[%c40_127, %c0_128], %91 {strides = array<i32>} : memref<72x144xf32, #tpu.memory_space<vmem>>, vector<8x144xf32>,
    %c0_129 = arith.constant 0 : index
    %c27_130 = arith.constant 27 : index
    %93 = vector.load %arg11[%c0_129, %c27_130] : memref<8x176xf32, #tpu.memory_space<vmem>>, vector<8x144xf32>
    %c48_131 = arith.constant 48 : index
    %c0_132 = arith.constant 0 : index
    %94 = vector.load %arg12[%c48_131, %c0_132] : memref<72x144xf32, #tpu.memory_space<vmem>>, vector<8x144xf32>
    tpu.vector_store %arg12[%c48_131, %c0_132], %93 {strides = array<i32>} : memref<72x144xf32, #tpu.memory_space<vmem>>, vector<8x144xf32>,
    %c0_133 = arith.constant 0 : index
    %c28_134 = arith.constant 28 : index
    %95 = vector.load %arg11[%c0_133, %c28_134] : memref<8x176xf32, #tpu.memory_space<vmem>>, vector<8x144xf32>
    %c56_135 = arith.constant 56 : index
    %c0_136 = arith.constant 0 : index
    %96 = vector.load %arg12[%c56_135, %c0_136] : memref<72x144xf32, #tpu.memory_space<vmem>>, vector<8x144xf32>
    tpu.vector_store %arg12[%c56_135, %c0_136], %95 {strides = array<i32>} : memref<72x144xf32, #tpu.memory_space<vmem>>, vector<8x144xf32>,
    %c0_137 = arith.constant 0 : index
    %c29_138 = arith.constant 29 : index
    %97 = vector.load %arg11[%c0_137, %c29_138] : memref<8x176xf32, #tpu.memory_space<vmem>>, vector<8x144xf32>
    %c64_139 = arith.constant 64 : index
    %c0_140 = arith.constant 0 : index
    %98 = vector.load %arg12[%c64_139, %c0_140] : memref<72x144xf32, #tpu.memory_space<vmem>>, vector<8x144xf32>
    tpu.vector_store %arg12[%c64_139, %c0_140], %97 {strides = array<i32>} : memref<72x144xf32, #tpu.memory_space<vmem>>, vector<8x144xf32>,
    %c0_141 = arith.constant 0 : index
    %c0_142 = arith.constant 0 : index
    %99 = vector.load %arg12[%c0_141, %c0_142] : memref<72x144xf32, #tpu.memory_space<vmem>>, vector<72x144xf32>
    %cst_143 = arith.constant dense<0.000000e+00> : vector<8x144xf32>
    %100 = tpu.matmul %77, %99, %cst_143 {dimension_numbers = #tpu.dot_dimension_numbers<[1], [0], [0], [1], [0, 0, 1, 1], [], []>} : vector<8x72xf32>, vector<72x144xf32>, vector<8x144xf32> -> vector<8x144xf32>
    %101 = vector.broadcast %79 : vector<8x1xf32> to vector<8x144xf32>
    %102 = arith.addf %100, %101 : vector<8x144xf32>
    %cst_144 = arith.constant 0.000000e+00 : f32
    %103 = vector.broadcast %cst_144 : f32 to vector<8x144xf32>
    %104 = arith.maximumf %102, %103 : vector<8x144xf32>
    %105 = arith.mulf %2, %104 : vector<8x144xf32>
    %c1_145 = arith.constant 1 : index
    %c1_146 = arith.constant 1 : index
    %c0_147 = arith.constant 0 : index
    %c0_148 = arith.constant 0 : index
    %106 = vector.load %arg4[%c1_145, %c1_146, %c0_147, %c0_148] : memref<2x2x8x72xf32, #tpu.memory_space<vmem>>, vector<1x1x8x72xf32>
    %107 = vector.shape_cast %106 : vector<1x1x8x72xf32> to vector<8x72xf32>
    %c1_149 = arith.constant 1 : index
    %c1_150 = arith.constant 1 : index
    %c0_151 = arith.constant 0 : index
    %c0_152 = arith.constant 0 : index
    %108 = vector.load %arg5[%c1_149, %c1_150, %c0_151, %c0_152] : memref<2x2x8x1xf32, #tpu.memory_space<vmem>>, vector<1x1x8x1xf32>
    %109 = vector.shape_cast %108 : vector<1x1x8x1xf32> to vector<8x1xf32>
    %c0_153 = arith.constant 0 : index
    %c16_154 = arith.constant 16 : index
    %110 = vector.load %arg11[%c0_153, %c16_154] : memref<8x176xf32, #tpu.memory_space<vmem>>, vector<8x144xf32>
    tpu.vector_store %arg11[%c0_153, %c16_154], %105 {strides = array<i32>} : memref<8x176xf32, #tpu.memory_space<vmem>>, vector<8x144xf32>,
    %c0_155 = arith.constant 0 : index
    %c3_156 = arith.constant 3 : index
    %111 = vector.load %arg11[%c0_155, %c3_156] : memref<8x176xf32, #tpu.memory_space<vmem>>, vector<8x144xf32>
    %c0_157 = arith.constant 0 : index
    %c0_158 = arith.constant 0 : index
    %112 = vector.load %arg12[%c0_157, %c0_158] : memref<72x144xf32, #tpu.memory_space<vmem>>, vector<8x144xf32>
    tpu.vector_store %arg12[%c0_157, %c0_158], %111 {strides = array<i32>} : memref<72x144xf32, #tpu.memory_space<vmem>>, vector<8x144xf32>,
    %c0_159 = arith.constant 0 : index
    %c4_160 = arith.constant 4 : index
    %113 = vector.load %arg11[%c0_159, %c4_160] : memref<8x176xf32, #tpu.memory_space<vmem>>, vector<8x144xf32>
    %c8_161 = arith.constant 8 : index
    %c0_162 = arith.constant 0 : index
    %114 = vector.load %arg12[%c8_161, %c0_162] : memref<72x144xf32, #tpu.memory_space<vmem>>, vector<8x144xf32>
    tpu.vector_store %arg12[%c8_161, %c0_162], %113 {strides = array<i32>} : memref<72x144xf32, #tpu.memory_space<vmem>>, vector<8x144xf32>,
    %c0_163 = arith.constant 0 : index
    %c5_164 = arith.constant 5 : index
    %115 = vector.load %arg11[%c0_163, %c5_164] : memref<8x176xf32, #tpu.memory_space<vmem>>, vector<8x144xf32>
    %c16_165 = arith.constant 16 : index
    %c0_166 = arith.constant 0 : index
    %116 = vector.load %arg12[%c16_165, %c0_166] : memref<72x144xf32, #tpu.memory_space<vmem>>, vector<8x144xf32>
    tpu.vector_store %arg12[%c16_165, %c0_166], %115 {strides = array<i32>} : memref<72x144xf32, #tpu.memory_space<vmem>>, vector<8x144xf32>,
    %c0_167 = arith.constant 0 : index
    %c15_168 = arith.constant 15 : index
    %117 = vector.load %arg11[%c0_167, %c15_168] : memref<8x176xf32, #tpu.memory_space<vmem>>, vector<8x144xf32>
    %c24_169 = arith.constant 24 : index
    %c0_170 = arith.constant 0 : index
    %118 = vector.load %arg12[%c24_169, %c0_170] : memref<72x144xf32, #tpu.memory_space<vmem>>, vector<8x144xf32>
    tpu.vector_store %arg12[%c24_169, %c0_170], %117 {strides = array<i32>} : memref<72x144xf32, #tpu.memory_space<vmem>>, vector<8x144xf32>,
    %c0_171 = arith.constant 0 : index
    %c16_172 = arith.constant 16 : index
    %119 = vector.load %arg11[%c0_171, %c16_172] : memref<8x176xf32, #tpu.memory_space<vmem>>, vector<8x144xf32>
    %c32_173 = arith.constant 32 : index
    %c0_174 = arith.constant 0 : index
    %120 = vector.load %arg12[%c32_173, %c0_174] : memref<72x144xf32, #tpu.memory_space<vmem>>, vector<8x144xf32>
    tpu.vector_store %arg12[%c32_173, %c0_174], %119 {strides = array<i32>} : memref<72x144xf32, #tpu.memory_space<vmem>>, vector<8x144xf32>,
    %c0_175 = arith.constant 0 : index
    %c17_176 = arith.constant 17 : index
    %121 = vector.load %arg11[%c0_175, %c17_176] : memref<8x176xf32, #tpu.memory_space<vmem>>, vector<8x144xf32>
    %c40_177 = arith.constant 40 : index
    %c0_178 = arith.constant 0 : index
    %122 = vector.load %arg12[%c40_177, %c0_178] : memref<72x144xf32, #tpu.memory_space<vmem>>, vector<8x144xf32>
    tpu.vector_store %arg12[%c40_177, %c0_178], %121 {strides = array<i32>} : memref<72x144xf32, #tpu.memory_space<vmem>>, vector<8x144xf32>,
    %c0_179 = arith.constant 0 : index
    %c27_180 = arith.constant 27 : index
    %123 = vector.load %arg11[%c0_179, %c27_180] : memref<8x176xf32, #tpu.memory_space<vmem>>, vector<8x144xf32>
    %c48_181 = arith.constant 48 : index
    %c0_182 = arith.constant 0 : index
    %124 = vector.load %arg12[%c48_181, %c0_182] : memref<72x144xf32, #tpu.memory_space<vmem>>, vector<8x144xf32>
    tpu.vector_store %arg12[%c48_181, %c0_182], %123 {strides = array<i32>} : memref<72x144xf32, #tpu.memory_space<vmem>>, vector<8x144xf32>,
    %c0_183 = arith.constant 0 : index
    %c28_184 = arith.constant 28 : index
    %125 = vector.load %arg11[%c0_183, %c28_184] : memref<8x176xf32, #tpu.memory_space<vmem>>, vector<8x144xf32>
    %c56_185 = arith.constant 56 : index
    %c0_186 = arith.constant 0 : index
    %126 = vector.load %arg12[%c56_185, %c0_186] : memref<72x144xf32, #tpu.memory_space<vmem>>, vector<8x144xf32>
    tpu.vector_store %arg12[%c56_185, %c0_186], %125 {strides = array<i32>} : memref<72x144xf32, #tpu.memory_space<vmem>>, vector<8x144xf32>,
    %c0_187 = arith.constant 0 : index
    %c29_188 = arith.constant 29 : index
    %127 = vector.load %arg11[%c0_187, %c29_188] : memref<8x176xf32, #tpu.memory_space<vmem>>, vector<8x144xf32>
    %c64_189 = arith.constant 64 : index
    %c0_190 = arith.constant 0 : index
    %128 = vector.load %arg12[%c64_189, %c0_190] : memref<72x144xf32, #tpu.memory_space<vmem>>, vector<8x144xf32>
    tpu.vector_store %arg12[%c64_189, %c0_190], %127 {strides = array<i32>} : memref<72x144xf32, #tpu.memory_space<vmem>>, vector<8x144xf32>,
    %c0_191 = arith.constant 0 : index
    %c0_192 = arith.constant 0 : index
    %129 = vector.load %arg12[%c0_191, %c0_192] : memref<72x144xf32, #tpu.memory_space<vmem>>, vector<72x144xf32>
    %cst_193 = arith.constant dense<0.000000e+00> : vector<8x144xf32>
    %130 = tpu.matmul %107, %129, %cst_193 {dimension_numbers = #tpu.dot_dimension_numbers<[1], [0], [0], [1], [0, 0, 1, 1], [], []>} : vector<8x72xf32>, vector<72x144xf32>, vector<8x144xf32> -> vector<8x144xf32>
    %131 = vector.broadcast %109 : vector<8x1xf32> to vector<8x144xf32>
    %132 = arith.addf %130, %131 : vector<8x144xf32>
    %133 = arith.mulf %2, %132 : vector<8x144xf32>
    %cst_194 = arith.constant 5.000000e-01 : f32
    %134 = vector.broadcast %cst_194 : f32 to vector<8x144xf32>
    %135 = arith.mulf %134, %133 : vector<8x144xf32>
    %136 = arith.addf %75, %135 : vector<8x144xf32>
    %c0_195 = arith.constant 0 : index
    %c0_196 = arith.constant 0 : index
    %137 = vector.load %arg7[%c0_195, %c0_196] : memref<144x4xf32, #tpu.memory_space<vmem>>, vector<144x4xf32>
    %cst_197 = arith.constant dense<0.000000e+00> : vector<8x4xf32>
    %138 = tpu.matmul %136, %137, %cst_197 {dimension_numbers = #tpu.dot_dimension_numbers<[1], [0], [0], [1], [0, 0, 1, 1], [], []>} : vector<8x144xf32>, vector<144x4xf32>, vector<8x4xf32> -> vector<8x4xf32>
    %c0_198 = arith.constant 0 : index
    %c0_199 = arith.constant 0 : index
    %139 = vector.load %arg9[%c0_198, %c0_199] : memref<1x10xf32, #tpu.memory_space<vmem>>, vector<1x10xf32>
    %140 = vector.extract_strided_slice %138 {offsets = [0, 0], sizes = [1, 4], strides = [1, 1]} : vector<8x4xf32> to vector<1x4xf32>
    %c0_200 = arith.constant 0 : index
    %c0_201 = arith.constant 0 : index
    %c0_202 = arith.constant 0 : index
    %141 = vector.load %arg8[%c0_200, %c0_201, %c0_202] : memref<8x4x10xf32, #tpu.memory_space<vmem>>, vector<1x4x10xf32>
    %142 = vector.shape_cast %141 : vector<1x4x10xf32> to vector<4x10xf32>
    %cst_203 = arith.constant dense<0.000000e+00> : vector<1x10xf32>
    %143 = tpu.matmul %140, %142, %cst_203 {dimension_numbers = #tpu.dot_dimension_numbers<[1], [0], [0], [1], [0, 0, 1, 1], [], []>} : vector<1x4xf32>, vector<4x10xf32>, vector<1x10xf32> -> vector<1x10xf32>
    %144 = arith.addf %139, %143 : vector<1x10xf32>
    %145 = vector.extract_strided_slice %138 {offsets = [1, 0], sizes = [1, 4], strides = [1, 1]} : vector<8x4xf32> to vector<1x4xf32>
    %c1_204 = arith.constant 1 : index
    %c0_205 = arith.constant 0 : index
    %c0_206 = arith.constant 0 : index
    %146 = vector.load %arg8[%c1_204, %c0_205, %c0_206] : memref<8x4x10xf32, #tpu.memory_space<vmem>>, vector<1x4x10xf32>
    %147 = vector.shape_cast %146 : vector<1x4x10xf32> to vector<4x10xf32>
    %cst_207 = arith.constant dense<0.000000e+00> : vector<1x10xf32>
    %148 = tpu.matmul %145, %147, %cst_207 {dimension_numbers = #tpu.dot_dimension_numbers<[1], [0], [0], [1], [0, 0, 1, 1], [], []>} : vector<1x4xf32>, vector<4x10xf32>, vector<1x10xf32> -> vector<1x10xf32>
    %149 = arith.addf %144, %148 : vector<1x10xf32>
    %150 = vector.extract_strided_slice %138 {offsets = [2, 0], sizes = [1, 4], strides = [1, 1]} : vector<8x4xf32> to vector<1x4xf32>
    %c2 = arith.constant 2 : index
    %c0_208 = arith.constant 0 : index
    %c0_209 = arith.constant 0 : index
    %151 = vector.load %arg8[%c2, %c0_208, %c0_209] : memref<8x4x10xf32, #tpu.memory_space<vmem>>, vector<1x4x10xf32>
    %152 = vector.shape_cast %151 : vector<1x4x10xf32> to vector<4x10xf32>
    %cst_210 = arith.constant dense<0.000000e+00> : vector<1x10xf32>
    %153 = tpu.matmul %150, %152, %cst_210 {dimension_numbers = #tpu.dot_dimension_numbers<[1], [0], [0], [1], [0, 0, 1, 1], [], []>} : vector<1x4xf32>, vector<4x10xf32>, vector<1x10xf32> -> vector<1x10xf32>
    %154 = arith.addf %149, %153 : vector<1x10xf32>
    %155 = vector.extract_strided_slice %138 {offsets = [3, 0], sizes = [1, 4], strides = [1, 1]} : vector<8x4xf32> to vector<1x4xf32>
    %c3_211 = arith.constant 3 : index
    %c0_212 = arith.constant 0 : index
    %c0_213 = arith.constant 0 : index
    %156 = vector.load %arg8[%c3_211, %c0_212, %c0_213] : memref<8x4x10xf32, #tpu.memory_space<vmem>>, vector<1x4x10xf32>
    %157 = vector.shape_cast %156 : vector<1x4x10xf32> to vector<4x10xf32>
    %cst_214 = arith.constant dense<0.000000e+00> : vector<1x10xf32>
    %158 = tpu.matmul %155, %157, %cst_214 {dimension_numbers = #tpu.dot_dimension_numbers<[1], [0], [0], [1], [0, 0, 1, 1], [], []>} : vector<1x4xf32>, vector<4x10xf32>, vector<1x10xf32> -> vector<1x10xf32>
    %159 = arith.addf %154, %158 : vector<1x10xf32>
    %160 = vector.extract_strided_slice %138 {offsets = [4, 0], sizes = [1, 4], strides = [1, 1]} : vector<8x4xf32> to vector<1x4xf32>
    %c4_215 = arith.constant 4 : index
    %c0_216 = arith.constant 0 : index
    %c0_217 = arith.constant 0 : index
    %161 = vector.load %arg8[%c4_215, %c0_216, %c0_217] : memref<8x4x10xf32, #tpu.memory_space<vmem>>, vector<1x4x10xf32>
    %162 = vector.shape_cast %161 : vector<1x4x10xf32> to vector<4x10xf32>
    %cst_218 = arith.constant dense<0.000000e+00> : vector<1x10xf32>
    %163 = tpu.matmul %160, %162, %cst_218 {dimension_numbers = #tpu.dot_dimension_numbers<[1], [0], [0], [1], [0, 0, 1, 1], [], []>} : vector<1x4xf32>, vector<4x10xf32>, vector<1x10xf32> -> vector<1x10xf32>
    %164 = arith.addf %159, %163 : vector<1x10xf32>
    %165 = vector.extract_strided_slice %138 {offsets = [5, 0], sizes = [1, 4], strides = [1, 1]} : vector<8x4xf32> to vector<1x4xf32>
    %c5_219 = arith.constant 5 : index
    %c0_220 = arith.constant 0 : index
    %c0_221 = arith.constant 0 : index
    %166 = vector.load %arg8[%c5_219, %c0_220, %c0_221] : memref<8x4x10xf32, #tpu.memory_space<vmem>>, vector<1x4x10xf32>
    %167 = vector.shape_cast %166 : vector<1x4x10xf32> to vector<4x10xf32>
    %cst_222 = arith.constant dense<0.000000e+00> : vector<1x10xf32>
    %168 = tpu.matmul %165, %167, %cst_222 {dimension_numbers = #tpu.dot_dimension_numbers<[1], [0], [0], [1], [0, 0, 1, 1], [], []>} : vector<1x4xf32>, vector<4x10xf32>, vector<1x10xf32> -> vector<1x10xf32>
    %169 = arith.addf %164, %168 : vector<1x10xf32>
    %170 = vector.extract_strided_slice %138 {offsets = [6, 0], sizes = [1, 4], strides = [1, 1]} : vector<8x4xf32> to vector<1x4xf32>
    %c6 = arith.constant 6 : index
    %c0_223 = arith.constant 0 : index
    %c0_224 = arith.constant 0 : index
    %171 = vector.load %arg8[%c6, %c0_223, %c0_224] : memref<8x4x10xf32, #tpu.memory_space<vmem>>, vector<1x4x10xf32>
    %172 = vector.shape_cast %171 : vector<1x4x10xf32> to vector<4x10xf32>
    %cst_225 = arith.constant dense<0.000000e+00> : vector<1x10xf32>
    %173 = tpu.matmul %170, %172, %cst_225 {dimension_numbers = #tpu.dot_dimension_numbers<[1], [0], [0], [1], [0, 0, 1, 1], [], []>} : vector<1x4xf32>, vector<4x10xf32>, vector<1x10xf32> -> vector<1x10xf32>
    %174 = arith.addf %169, %173 : vector<1x10xf32>
    %175 = vector.extract_strided_slice %138 {offsets = [7, 0], sizes = [1, 4], strides = [1, 1]} : vector<8x4xf32> to vector<1x4xf32>
    %c7 = arith.constant 7 : index
    %c0_226 = arith.constant 0 : index
    %c0_227 = arith.constant 0 : index
    %176 = vector.load %arg8[%c7, %c0_226, %c0_227] : memref<8x4x10xf32, #tpu.memory_space<vmem>>, vector<1x4x10xf32>
    %177 = vector.shape_cast %176 : vector<1x4x10xf32> to vector<4x10xf32>
    %cst_228 = arith.constant dense<0.000000e+00> : vector<1x10xf32>
    %178 = tpu.matmul %175, %177, %cst_228 {dimension_numbers = #tpu.dot_dimension_numbers<[1], [0], [0], [1], [0, 0, 1, 1], [], []>} : vector<1x4xf32>, vector<4x10xf32>, vector<1x10xf32> -> vector<1x10xf32>
    %179 = arith.addf %174, %178 : vector<1x10xf32>
    %c0_229 = arith.constant 0 : index
    %c0_230 = arith.constant 0 : index
    %c0_231 = arith.constant 0 : index
    %180 = vector.load %arg10[%c0_229, %c0_230, %c0_231] : memref<1x1x10xf32, #tpu.memory_space<vmem>>, vector<1x1x10xf32>
    %181 = vector.shape_cast %180 : vector<1x1x10xf32> to vector<1x10xf32>
    %182 = vector.shape_cast %179 : vector<1x10xf32> to vector<1x1x10xf32>
    tpu.vector_store %arg10[%c0_229, %c0_230, %c0_231], %182 {strides = array<i32>} : memref<1x1x10xf32, #tpu.memory_space<vmem>>, vector<1x1x10xf32>,
    return
  }
  func.func @transform_0(%arg0: i32) -> (i32, i32, i32) {
    %c0_i32 = arith.constant 0 : i32
    %c0_i32_0 = arith.constant 0 : i32
    %c0_i32_1 = arith.constant 0 : i32
    return %arg0, %c0_i32, %c0_i32_0 : i32, i32, i32
  }
  func.func @transform_1(%arg0: i32) -> (i32, i32) {
    %c0_i32 = arith.constant 0 : i32
    %c0_i32_0 = arith.constant 0 : i32
    %c0_i32_1 = arith.constant 0 : i32
    return %c0_i32, %c0_i32_0 : i32, i32
  }
  func.func @transform_2(%arg0: i32) -> (i32, i32) {
    %c0_i32 = arith.constant 0 : i32
    %c0_i32_0 = arith.constant 0 : i32
    %c0_i32_1 = arith.constant 0 : i32
    return %c0_i32, %c0_i32_0 : i32, i32
  }
  func.func @transform_3(%arg0: i32) -> (i32, i32, i32, i32) {
    %c0_i32 = arith.constant 0 : i32
    %c0_i32_0 = arith.constant 0 : i32
    %c0_i32_1 = arith.constant 0 : i32
    %c0_i32_2 = arith.constant 0 : i32
    %c0_i32_3 = arith.constant 0 : i32
    return %c0_i32, %c0_i32_0, %c0_i32_1, %c0_i32_2 : i32, i32, i32, i32
  }
  func.func @transform_4(%arg0: i32) -> (i32, i32, i32, i32) {
    %c0_i32 = arith.constant 0 : i32
    %c0_i32_0 = arith.constant 0 : i32
    %c0_i32_1 = arith.constant 0 : i32
    %c0_i32_2 = arith.constant 0 : i32
    %c0_i32_3 = arith.constant 0 : i32
    return %c0_i32, %c0_i32_0, %c0_i32_1, %c0_i32_2 : i32, i32, i32, i32
  }
  func.func @transform_5(%arg0: i32) -> (i32, i32) {
    %c0_i32 = arith.constant 0 : i32
    %c0_i32_0 = arith.constant 0 : i32
    %c0_i32_1 = arith.constant 0 : i32
    return %c0_i32, %c0_i32_0 : i32, i32
  }
  func.func @transform_6(%arg0: i32) -> (i32, i32) {
    %c0_i32 = arith.constant 0 : i32
    %c0_i32_0 = arith.constant 0 : i32
    %c0_i32_1 = arith.constant 0 : i32
    return %c0_i32, %c0_i32_0 : i32, i32
  }
  func.func @transform_7(%arg0: i32) -> (i32, i32, i32) {
    %c0_i32 = arith.constant 0 : i32
    %c0_i32_0 = arith.constant 0 : i32
    %c0_i32_1 = arith.constant 0 : i32
    %c0_i32_2 = arith.constant 0 : i32
    return %c0_i32, %c0_i32_0, %c0_i32_1 : i32, i32, i32
  }
  func.func @transform_8(%arg0: i32) -> (i32, i32) {
    %c0_i32 = arith.constant 0 : i32
    %c0_i32_0 = arith.constant 0 : i32
    %c0_i32_1 = arith.constant 0 : i32
    return %c0_i32, %c0_i32_0 : i32, i32
  }
  func.func @transform_9(%arg0: i32) -> (i32, i32, i32) {
    %c0_i32 = arith.constant 0 : i32
    %c0_i32_0 = arith.constant 0 : i32
    %c0_i32_1 = arith.constant 0 : i32
    return %arg0, %c0_i32, %c0_i32_0 : i32, i32, i32
  }
}

</mosaic_0001>

<bundles_post_ra>
// kernel: tiny_resnet_forward.1
= control target key start
LH: loop header
LB: loop body
LE: loop exit
PB: predicated region body
PF: predicated region fallthrough
CT: control target
= control target key end

     0   :  { %14 = vsyncpa [#allocation5], 0  ;;  %s3093_s0 = inlined_call_operand.vmem [shape: f32[2,80,144], index: 0, kind: input, shape index: {}]   ;;  %s3094_s1 = inlined_call_operand.vmem [shape: f32[8,80], index: 1, kind: input, shape index: {}]   ;;  %s3095_s2 = inlined_call_operand.vmem [shape: f32[8,1], index: 2, kind: input, shape index: {}]   ;;  %s3096_s3 = inlined_call_operand.vmem [shape: f32[2,2,8,72], index: 3, kind: input, shape index: {}]   ;;  %s3097_s4 = inlined_call_operand.vmem [shape: f32[2,2,8,1], index: 4, kind: input, shape index: {}]   ;;  %s3098_s5 = inlined_call_operand.vmem [shape: f32[1,144], index: 5, kind: input, shape index: {}]   ;;  %s3099_s6 = inlined_call_operand.vmem [shape: f32[144,4], index: 6, kind: input, shape index: {}]   ;;  %s3100_s7 = inlined_call_operand.vmem [shape: f32[8,4,10], index: 7, kind: input, shape index: {}]   ;;  %s3101_s8 = inlined_call_operand.vmem [shape: f32[1,10], index: 8, kind: input, shape index: {}]   ;;  %s3102_s9 = inlined_call_operand.hbm [shape: f32[2,1,10], index: 9, kind: output, shape index: {}]  }
   0x1   :  { %16 = vsyncpa [#allocation5 + $0x1], 0  ;;  %s2602_s30 = smov 0   ;;  %s2604_s10 = smov 0  }
   0x2   :  { %s2606_s11 = smov 0   ;;  %s2608_s12 = smov 0  }
   0x3 LB: > { %s2623_s13 = sadd.s32 4294967295, %s2535_s12   ;;  %s2193_s14 = sadd.s32 4294967294, %s2535_s12   ;;  %s2535_s12 = sphi %s2608_s12, %s3108_s12   ;;  %s2531_s11 = sphi %s2606_s11, %s3107_s11   ;;  %s2527_s10 = sphi %s2604_s10, %s3106_s10   ;;  %s2523_s30 = sphi %s2602_s30, %s3105_s30  }
   0x4   : > { %s2627_s15 = sadd.s32 1, %s2535_s12   ;;  %s223_s16 = sadd.s32 1, %s2531_s11 }
   0x5   : > { %s220_s17 = ssub.s32 %s2535_s12, %s2627_s15  ;;  %p233_p0 = scmp.ne.s32.totalorder %s2531_s11, %s2527_s10 }
   0x6   : > { %p221_p1 = scmp.eq.s32.totalorder %s220_s17, 0  ;;  %p234_p2 = scmp.eq.s32.totalorder %s2623_s13, 1 }
   0x7   : > { %p239_p3 = scmp.ne.s32.totalorder %s2527_s10, %s2523_s30  ;;  %p240_p4 = scmp.eq.s32.totalorder %s2193_s14, 1 }
   0x8   : > { %s2638_s18 = scalar_select %p221_p1, %s2531_s11, %s223_s16  }
   0x9   : > { %p2640_p5 = por %p234_p2, %p233_p0  ;;  %p2644_p6 = por %p240_p4, %p239_p3 }
   0xa   : > { %p2196_p7 = scmp.ge.s32.totalorder %s2535_s12, 1  ;;  %p290_p8 = scmp.lt.s32.totalorder %s2535_s12, 3 }
   0xc   : > { %p291_p9 = pnand %p2196_p7, %p290_p8 }
   0xd   : > { %p325_p10 = scmp.lt.s32.totalorder (!%p291_p9), %s2623_s13, 1  ;;  %v366_v0 = vld [vmem:[%s3095_s2] sm:$0xff] (!%p291_p9)  ;;  %v2537_v1 = vmov (!%p291_p9), 0.0   ;;  %v2538_v2 = vmov (!%p291_p9), 0   ;;  %vm372_vm0 = vcmask (!%p291_p9), 654336   ;;  %v332_v34 = vlaneseq (!%p291_p9)  ;;  %s2539_s17 = smov (!%p291_p9), 16  }
   0xe   : > { %294 = sbr.rel (%p291_p9) target bundleno = 2771 (0xad3), region = 56  ;;  %440 = vmatprep.mubr.f32.mxu0 (!%p291_p9), %v2537_v1  ;;  %342 = vst [vmem:[#allocation2] sm:$0xff] (!%p291_p9), %v2537_v1  ;;  %2471 = vset.pattern.permute.xlu0 (!%p291_p9), %v2538_v2  ;;  %v345_v33 = vld [vmem:[%s3094_s1] sm:$0xff] (!%p291_p9)  ;;  %vm343_vm1 = vcmask (!%p291_p9), 392192   ;;  %vm463_vm2 = vcmask (!%p291_p9), 1047680   ;;  %vm459_vm3 = vcmask (!%p291_p9), 130048  }
   0xf   : > { %369 = vperm.xlu0 (!%p291_p9), %2471, %v366_v0   ;;  %684 = vmatprep.mubr.f32.mxu1 (!%p291_p9), %v2537_v1  ;;  %v333_v35 = vshrl.u32 (!%p291_p9), %v332_v34, 7  ;;  %344 = vst.msk [vmem:[#allocation2 + $0x8] sm:$0xff] (!%p291_p9), %vm343_vm1, %v2537_v1  ;;  %v330_v38 = vld [vmem:[%s3098_s5] sm:$0x3] (!%p291_p9)  ;;  %vm465_vm4 = vcmask (!%p291_p9), 261120   ;;  %s2540_s21 = smov (!%p291_p9), 125  }
  0x10   : > { %2472 = vset.pattern.permute.xlu1 (!%p291_p9), %v2538_v2  ;;  %s2541_s22 = smov (!%p291_p9), 124   ;;  %s2544_s25 = smov (!%p291_p9), 112   ;;  %v452_v55 = vld [vmem:[%s3097_s4] sm:$0xff] (!%p291_p9)  ;;  %vm489_vm5 = vcmask (!%p291_p9), 1014784   ;;  %vm475_vm6 = vcmask (!%p291_p9), 1022976   ;;  %vm517_vm7 = vcmask (!%p291_p9), 924672  }
  0x11   : > { %v334_v36 = vsub.s32 (!%p291_p9), 0, %v333_v35  ;;  %v338_v39 = vsub.s32 (!%p291_p9), 1, %v333_v35  ;;  %s2545_s26 = smov (!%p291_p9), 111   ;;  %s2547_s28 = smov (!%p291_p9), 100   ;;  %vm503_vm8 = vcmask (!%p291_p9), 1006592   ;;  %vm545_vm9 = vcmask (!%p291_p9), 908288  }
  0x12   : > { %s2548_s29 = smov (!%p291_p9), 99   ;;  %vm531_vm10 = vcmask (!%p291_p9), 916480   ;;  %vm573_vm11 = vcmask (!%p291_p9), 818176   ;;  %vm559_vm12 = vcmask (!%p291_p9), 826368   ;;  %vm587_vm13 = vcmask (!%p291_p9), 809984   ;;  %s2233_s16 = sshll.u32 (!%p291_p9), %s2623_s13, 4 }
  0x13   : > { %v2691_v41 = vrot.slane (!%p291_p9), %v330_v38, %v334_v36  ;;  %v2693_v45 = vrot.slane (!%p291_p9), %v330_v38, %v338_v39  ;;  %v451_v36 = vld [vmem:[%s3096_s3] sm:$0xff] (!%p291_p9)  ;;  %vm616_vm14 = vcmask (!%p291_p9), 588800   ;;  %vm1495_vm15 = vcmask (!%p291_p9), 1043456  }
  0x14   : > { %vm1491_vm1 = vcmask (!%p291_p9), 31744  }
  0x15   : > { %s326_s23 = scalar_select %p325_p10, %s2623_s13, 1 }
  0x17   : > { %s2417_s24 = smul.u32 160, %s326_s23  ;;  %s2542_s23 = smov 123  }
  0x19   : > { %s2661_s27 = scalar_lea.vmem %s3093_s0, %s2417_s24  ;;  %s2543_s24 = smov 113  }
  0x1a   : > { %v347_v3 = vld [vmem:[%s2661_s27 + $0x8] sm:$0xff]  ;;  %v349_v4 = vld [vmem:[%s2661_s27 + $0x18] sm:$0xff]  ;;  %v346_v5 = vld [vmem:[%s2661_s27] sm:$0xff] }
  0x1b   : > { %v2292_v6 = vpack.c.bf16 %v349_v4, %v347_v3  ;;  %v348_v7 = vld [vmem:[%s2661_s27 + $0x10] sm:$0xff]  ;;  %v351_v8 = vld [vmem:[%s2661_s27 + $0x28] sm:$0xff]  ;;  %v353_v9 = vld [vmem:[%s2661_s27 + $0x38] sm:$0xff] }
  0x1c   : > { %v2294_v10 = vpack.c.bf16 %v348_v7, %v346_v5  ;;  %v2296_v11 = vpack.c.bf16 %v353_v9, %v351_v8  ;;  %v350_v12 = vld [vmem:[%s2661_s27 + $0x20] sm:$0xff]  ;;  %v352_v13 = vld [vmem:[%s2661_s27 + $0x30] sm:$0xff]  ;;  %v355_v14 = vld [vmem:[%s2661_s27 + $0x48] sm:$0xff] }
  0x1d   : > { %2293 = vmatprep.subr.bf16.mxu0 %v2292_v6  ;;  %v357_v15 = vld [vmem:[%s2661_s27 + $0x58] sm:$0xff]  ;;  %v2298_v16 = vpack.c.bf16 %v352_v13, %v350_v12  ;;  %v354_v18 = vld [vmem:[%s2661_s27 + $0x40] sm:$0xff]  ;;  %v356_v19 = vld [vmem:[%s2661_s27 + $0x50] sm:$0xff] }
  0x1e   : > { %2295 = vmatpush1.bf16.msra.mxu0 %v2294_v10  ;;  %v2300_v17 = vpack.c.bf16 %v357_v15, %v355_v14  ;;  %v359_v20 = vld [vmem:[%s2661_s27 + $0x68] sm:$0xff]  ;;  %v361_v21 = vld [vmem:[%s2661_s27 + $0x78] sm:$0xff]  ;;  %v2302_v22 = vpack.c.bf16 %v356_v19, %v354_v18  ;;  %v358_v24 = vld [vmem:[%s2661_s27 + $0x60] sm:$0xff] }
  0x1f   : > { %2297 = vmatprep.subr.bf16.mxu0 %v2296_v11  ;;  %v2304_v23 = vpack.c.bf16 %v361_v21, %v359_v20  ;;  %v360_v25 = vld [vmem:[%s2661_s27 + $0x70] sm:$0xff]  ;;  %v363_v26 = vld [vmem:[%s2661_s27 + $0x88] sm:$0xff]  ;;  %v365_v27 = vld [vmem:[%s2661_s27 + $0x98] sm:$0xff] }
  0x20   : > { %v2306_v28 = vpack.c.bf16 %v360_v25, %v358_v24  ;;  %v2308_v29 = vpack.c.bf16 %v365_v27, %v363_v26  ;;  %v362_v30 = vld [vmem:[%s2661_s27 + $0x80] sm:$0xff]  ;;  %v364_v31 = vld [vmem:[%s2661_s27 + $0x90] sm:$0xff]  ;;  %s2546_s27 = smov 101  }
  0x21   : > { %v2310_v32 = vpack.c.bf16 %v364_v31, %v362_v30 }
  0x22   : > { %2299 = vmatpush1.bf16.msra.mxu0 %v2298_v16 }
  0x23   : > { %2301 = vmatprep.subr.bf16.mxu0 %v2300_v17 }
  0x26   : > { %2303 = vmatpush1.bf16.msra.mxu0 %v2302_v22 }
  0x27   : > { %2305 = vmatprep.subr.bf16.mxu0 %v2304_v23 }
  0x2a   : > { %2307 = vmatpush1.bf16.msra.mxu0 %v2306_v28 }
  0x2b   : > { %2309 = vmatprep.subr.bf16.mxu0 %v2308_v29 }
  0x2e   : > { %2311 = vmatpush1.bf16.msra.mxu0 %v2310_v32 }
  0x31   : > { %2198 = vmatmul.mubr.msk.f32.vlgmr.msra.gmra.mrb[0].mxu0 %vm372_vm0, %v345_v33  ;;  %vm2550_vm0 = vmmov 0  }
  0x32   : > { %1152 = vmatprep.mubr.f32.mxu0 %v2537_v1 }
  0x8e   : > { %v370_v37 = vpop.permute.xlu0 %369 }
 0x104   : > { %v442_v40 = vpop.f32.mrb[0].mxu0 }
 0x105   : > { %v443_v42 = vadd.f32 %v442_v40, %v370_v37  ;;  %v444_v43 = vpop.f32.mrb[1].mxu0 }
 0x106   : > { %v445_v44 = vadd.f32 %v444_v43, %v370_v37 }
 0x107   : > { %v447_v46 = vmax.f32 %v443_v42, 0.0 }
 0x108   : > { %v448_v47 = vmax.f32 %v445_v44, 0.0 }
 0x109   : > { %v2696_v48 = vmul.f32 %v447_v46, %v2691_v41 }
 0x10a   : > { %v2699_v49 = vmul.f32 %v448_v47, %v2693_v45 }
 0x10b   : > { %455 = vrot.lane.b32.xlu0 %v2696_v48, %s2539_s17 }
 0x10c   : > { %457 = vrot.lane.b32.xlu1 %v2699_v49, %s2539_s17 }
 0x17d   : > { %v456_v50 = vpop.permute.xlu0 %455 }
 0x17e   : > { %464 = vst.msk [vmem:[#allocation2] sm:$0xff] %vm463_vm2, %v456_v50  ;;  %v458_v51 = vpop.permute.xlu1 %457 }
 0x17f   : > { %v460_v52 = vsel %vm459_vm3, %v456_v50, %v458_v51 }
 0x180   : > { %466 = vst.msk [vmem:[#allocation2 + $0x8] sm:$0xff] %vm465_vm4, %v460_v52 }
 0x185   : > { %v467_v53 = vld [vmem:[#allocation2] sm:$0xff] }
 0x186   : > { %471 = vrot.lane.b32.xlu1 %v467_v53, %s2540_s21 }
 0x187   : > { %v468_v54 = vld [vmem:[#allocation2 + $0x8] sm:$0xff] }
 0x188   : > { %473 = vrot.lane.b32.xlu0 %v468_v54, %s2540_s21 }
 0x18a   : > { %485 = vrot.lane.b32.xlu1 %v467_v53, %s2541_s22 }
 0x18c   : > { %487 = vrot.lane.b32.xlu0 %v468_v54, %s2541_s22 }
 0x18e   : > { %499 = vrot.lane.b32.xlu1 %v467_v53, %s2542_s23 }
 0x190   : > { %501 = vrot.lane.b32.xlu0 %v468_v54, %s2542_s23 }
 0x192   : > { %513 = vrot.lane.b32.xlu1 %v467_v53, %s2543_s24 }
 0x194   : > { %515 = vrot.lane.b32.xlu0 %v468_v54, %s2543_s24 }
 0x196   : > { %527 = vrot.lane.b32.xlu1 %v467_v53, %s2544_s25 }
 0x198   : > { %529 = vrot.lane.b32.xlu0 %v468_v54, %s2544_s25 }
 0x19a   : > { %541 = vrot.lane.b32.xlu1 %v467_v53, %s2545_s26 }
 0x19c   : > { %543 = vrot.lane.b32.xlu0 %v468_v54, %s2545_s26 }
 0x19e   : > { %555 = vrot.lane.b32.xlu1 %v467_v53, %s2546_s27 }
 0x1a0   : > { %557 = vrot.lane.b32.xlu0 %v468_v54, %s2546_s27 }
 0x1a2   : > { %569 = vrot.lane.b32.xlu1 %v467_v53, %s2547_s28 }
 0x1a4   : > { %571 = vrot.lane.b32.xlu0 %v468_v54, %s2547_s28 }
 0x1a6   : > { %583 = vrot.lane.b32.xlu1 %v467_v53, %s2548_s29 }
 0x1a8   : > { %585 = vrot.lane.b32.xlu0 %v468_v54, %s2548_s29 }
 0x1aa   : > { %613 = vperm.xlu1 %2472, %v452_v55  }
 0x1f8   : > { %v472_v56 = vpop.permute.xlu1 %471 }
 0x1fa   : > { %v474_v57 = vpop.permute.xlu0 %473 }
 0x1fb   : > { %480 = vst.msk [vmem:[#allocation3 + $0x8] sm:$0xff] %vm459_vm3, %v474_v57  ;;  %v476_v4 = vsel %vm475_vm6, %v472_v56, %v474_v57  ;;  %v2201_v56 = vld [vmem:[%s3097_s4 + $0x8] sm:$0xff] }
 0x1fc   : > { %v486_v58 = vpop.permute.xlu1 %485 }
 0x1fe   : > { %v488_v59 = vpop.permute.xlu0 %487 }
 0x1ff   : > { %494 = vst.msk [vmem:[#allocation3 + $0x18] sm:$0xff] %vm459_vm3, %v488_v59  ;;  %v490_v63 = vsel %vm489_vm5, %v486_v58, %v488_v59 }
 0x200   : > { %v500_v60 = vpop.permute.xlu1 %499  ;;  %v2314_v6 = vpack.c.bf16 %v490_v63, %v476_v4 }
 0x202   : > { %v502_v61 = vpop.permute.xlu0 %501  ;;  %v594_v2 = vld [vmem:[#allocation3 + $0x8] sm:$0xff] }
 0x203   : > { %508 = vst.msk [vmem:[#allocation3 + $0x28] sm:$0xff] %vm459_vm3, %v502_v61  ;;  %v504_v13 = vsel %vm503_vm8, %v500_v60, %v502_v61 }
 0x204   : > { %v514_v62 = vpop.permute.xlu1 %513 }
 0x206   : > { %v516_v0 = vpop.permute.xlu0 %515  ;;  %v596_v3 = vld [vmem:[#allocation3 + $0x18] sm:$0xff] }
 0x207   : > { %522 = vst.msk [vmem:[#allocation3 + $0x38] sm:$0xff] %vm459_vm3, %v516_v0  ;;  %v2312_v5 = vpack.c.bf16 %v596_v3, %v594_v2  ;;  %v518_v9 = vsel %vm517_vm7, %v514_v62, %v516_v0 }
 0x208   : > { %v528_v7 = vpop.permute.xlu1 %527  ;;  %v2318_v16 = vpack.c.bf16 %v518_v9, %v504_v13 }
 0x209   : > { %2313 = vmatprep.subr.bf16.mxu1 %v2312_v5 }
 0x20a   : > { %2315 = vmatpush1.bf16.msra.mxu1 %v2314_v6  ;;  %v530_v8 = vpop.permute.xlu0 %529  ;;  %v598_v11 = vld [vmem:[#allocation3 + $0x28] sm:$0xff] }
 0x20b   : > { %536 = vst.msk [vmem:[#allocation3 + $0x48] sm:$0xff] %vm459_vm3, %v530_v8  ;;  %v532_v23 = vsel %vm531_vm10, %v528_v7, %v530_v8 }
 0x20c   : > { %v542_v15 = vpop.permute.xlu1 %541 }
 0x20e   : > { %v544_v10 = vpop.permute.xlu0 %543  ;;  %v600_v12 = vld [vmem:[#allocation3 + $0x38] sm:$0xff] }
 0x20f   : > { %550 = vst.msk [vmem:[#allocation3 + $0x58] sm:$0xff] %vm459_vm3, %v544_v10  ;;  %v2316_v14 = vpack.c.bf16 %v600_v12, %v598_v11  ;;  %v546_v18 = vsel %vm545_vm9, %v542_v15, %v544_v10 }
 0x210   : > { %v556_v19 = vpop.permute.xlu1 %555  ;;  %v2322_v25 = vpack.c.bf16 %v546_v18, %v532_v23 }
 0x211   : > { %2317 = vmatprep.subr.bf16.mxu1 %v2316_v14 }
 0x212   : > { %2319 = vmatpush1.bf16.msra.mxu1 %v2318_v16  ;;  %v558_v17 = vpop.permute.xlu0 %557  ;;  %v602_v21 = vld [vmem:[#allocation3 + $0x48] sm:$0xff] }
 0x213   : > { %564 = vst.msk [vmem:[#allocation3 + $0x68] sm:$0xff] %vm459_vm3, %v558_v17  ;;  %v560_v31 = vsel %vm559_vm12, %v556_v19, %v558_v17 }
 0x214   : > { %v570_v27 = vpop.permute.xlu1 %569 }
 0x216   : > { %v572_v20 = vpop.permute.xlu0 %571  ;;  %v604_v22 = vld [vmem:[#allocation3 + $0x58] sm:$0xff] }
 0x217   : > { %578 = vst.msk [vmem:[#allocation3 + $0x78] sm:$0xff] %vm459_vm3, %v572_v20  ;;  %v2320_v24 = vpack.c.bf16 %v604_v22, %v602_v21  ;;  %v574_v28 = vsel %vm573_vm11, %v570_v27, %v572_v20 }
 0x218   : > { %v2326_v33 = vpack.c.bf16 %v574_v28, %v560_v31  ;;  %v584_v35 = vpop.permute.xlu1 %583 }
 0x219   : > { %2321 = vmatprep.subr.bf16.mxu1 %v2320_v24 }
 0x21a   : > { %2323 = vmatpush1.bf16.msra.mxu1 %v2322_v25  ;;  %v586_v26 = vpop.permute.xlu0 %585  ;;  %v606_v29 = vld [vmem:[#allocation3 + $0x68] sm:$0xff] }
 0x21b   : > { %592 = vst.msk [vmem:[#allocation3 + $0x88] sm:$0xff] %vm459_vm3, %v586_v26  ;;  %v588_v37 = vsel %vm587_vm13, %v584_v35, %v586_v26 }
 0x21e   : > { %v608_v30 = vld [vmem:[#allocation3 + $0x78] sm:$0xff] }
 0x21f   : > { %v2324_v32 = vpack.c.bf16 %v608_v30, %v606_v29 }
 0x221   : > { %2325 = vmatprep.subr.bf16.mxu1 %v2324_v32 }
 0x222   : > { %2327 = vmatpush1.bf16.msra.mxu1 %v2326_v33  ;;  %v610_v34 = vld [vmem:[#allocation3 + $0x88] sm:$0xff] }
 0x223   : > { %636 = vmatprep.subr.mxu1 %v610_v34 }
 0x226   : > { %637 = vmatpush1.msra.mxu1 %v588_v37  ;;  %v2200_v37 = vld [vmem:[%s3096_s3 + $0x8] sm:$0xff] }
 0x227   : > { %2199 = vmatmul.mubr.msk.f32.vlgmr.msra.gmra.mrb[0].mxu1 %vm616_vm14, %v451_v36 }
 0x228   : > { %917 = vmatprep.mubr.f32.mxu1 %v2537_v1 }
 0x229   : > { %v614_v38 = vpop.permute.xlu1 %613 }
 0x2fa   : > { %v686_v39 = vpop.f32.mrb[0].mxu1 }
 0x2fb   : > { %v687_v40 = vadd.f32 %v686_v39, %v614_v38  ;;  %v688_v42 = vpop.f32.mrb[1].mxu1 }
 0x2fc   : > { %v689_v43 = vadd.f32 %v688_v42, %v614_v38 }
 0x2fd   : > { %v691_v44 = vmax.f32 %v687_v40, 0.0 }
 0x2fe   : > { %v692_v46 = vmax.f32 %v689_v43, 0.0 }
 0x2ff   : > { %v693_v47 = vmul.f32 %v691_v44, %v2691_v41 }
 0x300   : > { %v694_v50 = vmul.f32 %v692_v46, %v2693_v45 }
 0x301   : > { %701 = vrot.lane.b32.xlu0 %v693_v47, %s2539_s17 }
 0x302   : > { %703 = vrot.lane.b32.xlu1 %v694_v50, %s2539_s17 }
 0x373   : > { %v702_v51 = vpop.permute.xlu0 %701 }
 0x374   : > { %708 = vst.msk [vmem:[#allocation2] sm:$0xff] %vm463_vm2, %v702_v51  ;;  %v704_v52 = vpop.permute.xlu1 %703 }
 0x375   : > { %v705_v53 = vsel %vm459_vm3, %v702_v51, %v704_v52 }
 0x376   : > { %709 = vst.msk [vmem:[#allocation2 + $0x8] sm:$0xff] %vm465_vm4, %v705_v53 }
 0x37b   : > { %v710_v54 = vld [vmem:[#allocation2] sm:$0xff] }
 0x37c   : > { %714 = vrot.lane.b32.xlu0 %v710_v54, %s2540_s21 }
 0x37d   : > { %v711_v55 = vld [vmem:[#allocation2 + $0x8] sm:$0xff] }
 0x37e   : > { %716 = vrot.lane.b32.xlu1 %v711_v55, %s2540_s21 }
 0x380   : > { %727 = vrot.lane.b32.xlu0 %v710_v54, %s2541_s22 }
 0x382   : > { %729 = vrot.lane.b32.xlu1 %v711_v55, %s2541_s22 }
 0x384   : > { %740 = vrot.lane.b32.xlu0 %v710_v54, %s2542_s23 }
 0x386   : > { %742 = vrot.lane.b32.xlu1 %v711_v55, %s2542_s23 }
 0x388   : > { %753 = vrot.lane.b32.xlu0 %v710_v54, %s2543_s24 }
 0x38a   : > { %755 = vrot.lane.b32.xlu1 %v711_v55, %s2543_s24 }
 0x38c   : > { %766 = vrot.lane.b32.xlu0 %v710_v54, %s2544_s25 }
 0x38e   : > { %768 = vrot.lane.b32.xlu1 %v711_v55, %s2544_s25 }
 0x390   : > { %779 = vrot.lane.b32.xlu0 %v710_v54, %s2545_s26 }
 0x392   : > { %781 = vrot.lane.b32.xlu1 %v711_v55, %s2545_s26 }
 0x394   : > { %792 = vrot.lane.b32.xlu0 %v710_v54, %s2546_s27 }
 0x396   : > { %794 = vrot.lane.b32.xlu1 %v711_v55, %s2546_s27 }
 0x398   : > { %805 = vrot.lane.b32.xlu0 %v710_v54, %s2547_s28 }
 0x39a   : > { %807 = vrot.lane.b32.xlu1 %v711_v55, %s2547_s28 }
 0x39c   : > { %818 = vrot.lane.b32.xlu0 %v710_v54, %s2548_s29 }
 0x39e   : > { %820 = vrot.lane.b32.xlu1 %v711_v55, %s2548_s29 }
 0x3a0   : > { %847 = vperm.xlu0 %2471, %v2201_v56  }
 0x3ee   : > { %v715_v57 = vpop.permute.xlu0 %714 }
 0x3f0   : > { %v717_v58 = vpop.permute.xlu1 %716 }
 0x3f1   : > { %722 = vst.msk [vmem:[#allocation3 + $0x8] sm:$0xff] %vm459_vm3, %v717_v58  ;;  %v718_v5 = vsel %vm475_vm6, %v715_v57, %v717_v58 }
 0x3f2   : > { %v728_v59 = vpop.permute.xlu0 %727 }
 0x3f4   : > { %v730_v60 = vpop.permute.xlu1 %729 }
 0x3f5   : > { %735 = vst.msk [vmem:[#allocation3 + $0x18] sm:$0xff] %vm459_vm3, %v730_v60  ;;  %v731_v0 = vsel %vm489_vm5, %v728_v59, %v730_v60 }
 0x3f6   : > { %v741_v61 = vpop.permute.xlu0 %740  ;;  %v2330_v7 = vpack.c.bf16 %v731_v0, %v718_v5 }
 0x3f8   : > { %v743_v62 = vpop.permute.xlu1 %742  ;;  %v828_v3 = vld [vmem:[#allocation3 + $0x8] sm:$0xff] }
 0x3f9   : > { %748 = vst.msk [vmem:[#allocation3 + $0x28] sm:$0xff] %vm459_vm3, %v743_v62  ;;  %v744_v14 = vsel %vm503_vm8, %v741_v61, %v743_v62 }
 0x3fa   : > { %v754_v63 = vpop.permute.xlu0 %753 }
 0x3fc   : > { %v756_v2 = vpop.permute.xlu1 %755  ;;  %v830_v4 = vld [vmem:[#allocation3 + $0x18] sm:$0xff] }
 0x3fd   : > { %761 = vst.msk [vmem:[#allocation3 + $0x38] sm:$0xff] %vm459_vm3, %v756_v2  ;;  %v2328_v6 = vpack.c.bf16 %v830_v4, %v828_v3  ;;  %v757_v10 = vsel %vm517_vm7, %v754_v63, %v756_v2 }
 0x3fe   : > { %v767_v8 = vpop.permute.xlu0 %766  ;;  %v2334_v17 = vpack.c.bf16 %v757_v10, %v744_v14 }
 0x3ff   : > { %2329 = vmatprep.subr.bf16.mxu1 %v2328_v6 }
 0x400   : > { %2331 = vmatpush1.bf16.msra.mxu1 %v2330_v7  ;;  %v769_v9 = vpop.permute.xlu1 %768  ;;  %v832_v12 = vld [vmem:[#allocation3 + $0x28] sm:$0xff] }
 0x401   : > { %774 = vst.msk [vmem:[#allocation3 + $0x48] sm:$0xff] %vm459_vm3, %v769_v9  ;;  %v770_v24 = vsel %vm531_vm10, %v767_v8, %v769_v9 }
 0x402   : > { %v780_v16 = vpop.permute.xlu0 %779 }
 0x404   : > { %v782_v11 = vpop.permute.xlu1 %781  ;;  %v834_v13 = vld [vmem:[#allocation3 + $0x38] sm:$0xff] }
 0x405   : > { %787 = vst.msk [vmem:[#allocation3 + $0x58] sm:$0xff] %vm459_vm3, %v782_v11  ;;  %v2332_v15 = vpack.c.bf16 %v834_v13, %v832_v12  ;;  %v783_v19 = vsel %vm545_vm9, %v780_v16, %v782_v11 }
 0x406   : > { %v793_v20 = vpop.permute.xlu0 %792  ;;  %v2338_v26 = vpack.c.bf16 %v783_v19, %v770_v24 }
 0x407   : > { %2333 = vmatprep.subr.bf16.mxu1 %v2332_v15 }
 0x408   : > { %2335 = vmatpush1.bf16.msra.mxu1 %v2334_v17  ;;  %v795_v18 = vpop.permute.xlu1 %794  ;;  %v836_v22 = vld [vmem:[#allocation3 + $0x48] sm:$0xff] }
 0x409   : > { %800 = vst.msk [vmem:[#allocation3 + $0x68] sm:$0xff] %vm459_vm3, %v795_v18  ;;  %v796_v32 = vsel %vm559_vm12, %v793_v20, %v795_v18 }
 0x40a   : > { %v806_v28 = vpop.permute.xlu0 %805 }
 0x40c   : > { %v808_v21 = vpop.permute.xlu1 %807  ;;  %v838_v23 = vld [vmem:[#allocation3 + $0x58] sm:$0xff] }
 0x40d   : > { %813 = vst.msk [vmem:[#allocation3 + $0x78] sm:$0xff] %vm459_vm3, %v808_v21  ;;  %v2336_v25 = vpack.c.bf16 %v838_v23, %v836_v22  ;;  %v809_v29 = vsel %vm573_vm11, %v806_v28, %v808_v21 }
 0x40e   : > { %v2342_v34 = vpack.c.bf16 %v809_v29, %v796_v32  ;;  %v819_v36 = vpop.permute.xlu0 %818 }
 0x40f   : > { %2337 = vmatprep.subr.bf16.mxu1 %v2336_v25 }
 0x410   : > { %2339 = vmatpush1.bf16.msra.mxu1 %v2338_v26  ;;  %v821_v27 = vpop.permute.xlu1 %820  ;;  %v840_v30 = vld [vmem:[#allocation3 + $0x68] sm:$0xff] }
 0x411   : > { %826 = vst.msk [vmem:[#allocation3 + $0x88] sm:$0xff] %vm459_vm3, %v821_v27  ;;  %v822_v38 = vsel %vm587_vm13, %v819_v36, %v821_v27 }
 0x414   : > { %v842_v31 = vld [vmem:[#allocation3 + $0x78] sm:$0xff] }
 0x415   : > { %v2340_v33 = vpack.c.bf16 %v842_v31, %v840_v30 }
 0x417   : > { %2341 = vmatprep.subr.bf16.mxu1 %v2340_v33 }
 0x418   : > { %2343 = vmatpush1.bf16.msra.mxu1 %v2342_v34  ;;  %v844_v35 = vld [vmem:[#allocation3 + $0x88] sm:$0xff] }
 0x419   : > { %869 = vmatprep.subr.mxu1 %v844_v35 }
 0x41c   : > { %870 = vmatpush1.msra.mxu1 %v822_v38  ;;  %v2203_v38 = vld [vmem:[%s3096_s3 + $0x10] sm:$0xff] }
 0x41d   : > { %2202 = vmatmul.mubr.msk.f32.vlgmr.msra.gmra.mrb[2].mxu1 %vm616_vm14, %v2200_v37 }
 0x41e   : > { %1385 = vmatprep.mubr.f32.mxu1 %v2537_v1 }
 0x41f   : > { %v848_v39 = vpop.permute.xlu0 %847 }
 0x4f0   : > { %v919_v40 = vpop.f32.mrb[2].mxu1 }
 0x4f1   : > { %v920_v42 = vadd.f32 %v919_v40, %v848_v39  ;;  %v921_v43 = vpop.f32.mrb[3].mxu1 }
 0x4f2   : > { %v922_v44 = vadd.f32 %v921_v43, %v848_v39 }
 0x4f3   : > { %v924_v46 = vmul.f32 %v920_v42, %v2691_v41 }
 0x4f4   : > { %v925_v47 = vmul.f32 %v922_v44, %v2693_v45 }
 0x4f5   : > { %v926_v50 = vmul.f32 0.5, %v924_v46 }
 0x4f6   : > { %v927_v51 = vmul.f32 0.5, %v925_v47 }
 0x4f7   : > { %v2806_v52 = vadd.f32 %v926_v50, %v2696_v48 }
 0x4f8   : > { %v2809_v53 = vadd.f32 %v927_v51, %v2699_v49  ;;  %v2204_v49 = vld [vmem:[%s3097_s4 + $0x10] sm:$0xff] }
 0x4f9   : > { %936 = vrot.lane.b32.xlu1 %v2806_v52, %s2539_s17 }
 0x4fa   : > { %938 = vrot.lane.b32.xlu0 %v2809_v53, %s2539_s17 }
 0x56b   : > { %v937_v54 = vpop.permute.xlu1 %936 }
 0x56c   : > { %943 = vst.msk [vmem:[#allocation2] sm:$0xff] %vm463_vm2, %v937_v54  ;;  %v939_v55 = vpop.permute.xlu0 %938 }
 0x56d   : > { %v940_v56 = vsel %vm459_vm3, %v937_v54, %v939_v55 }
 0x56e   : > { %944 = vst.msk [vmem:[#allocation2 + $0x8] sm:$0xff] %vm465_vm4, %v940_v56 }
 0x573   : > { %v945_v57 = vld [vmem:[#allocation2] sm:$0xff] }
 0x574   : > { %949 = vrot.lane.b32.xlu1 %v945_v57, %s2540_s21 }
 0x575   : > { %v946_v48 = vld [vmem:[#allocation2 + $0x8] sm:$0xff] }
 0x576   : > { %951 = vrot.lane.b32.xlu0 %v946_v48, %s2540_s21 }
 0x578   : > { %962 = vrot.lane.b32.xlu1 %v945_v57, %s2541_s22 }
 0x57a   : > { %964 = vrot.lane.b32.xlu0 %v946_v48, %s2541_s22 }
 0x57c   : > { %975 = vrot.lane.b32.xlu1 %v945_v57, %s2542_s23 }
 0x57e   : > { %977 = vrot.lane.b32.xlu0 %v946_v48, %s2542_s23 }
 0x580   : > { %988 = vrot.lane.b32.xlu1 %v945_v57, %s2543_s24 }
 0x582   : > { %990 = vrot.lane.b32.xlu0 %v946_v48, %s2543_s24 }
 0x584   : > { %1001 = vrot.lane.b32.xlu1 %v945_v57, %s2544_s25 }
 0x586   : > { %1003 = vrot.lane.b32.xlu0 %v946_v48, %s2544_s25 }
 0x588   : > { %1014 = vrot.lane.b32.xlu1 %v945_v57, %s2545_s26 }
 0x58a   : > { %1016 = vrot.lane.b32.xlu0 %v946_v48, %s2545_s26 }
 0x58c   : > { %1027 = vrot.lane.b32.xlu1 %v945_v57, %s2546_s27 }
 0x58e   : > { %1029 = vrot.lane.b32.xlu0 %v946_v48, %s2546_s27 }
 0x590   : > { %1040 = vrot.lane.b32.xlu1 %v945_v57, %s2547_s28 }
 0x592   : > { %1042 = vrot.lane.b32.xlu0 %v946_v48, %s2547_s28 }
 0x594   : > { %1053 = vrot.lane.b32.xlu1 %v945_v57, %s2548_s29 }
 0x596   : > { %1055 = vrot.lane.b32.xlu0 %v946_v48, %s2548_s29 }
 0x598   : > { %1082 = vperm.xlu1 %2472, %v2204_v49  }
 0x5e6   : > { %v950_v58 = vpop.permute.xlu1 %949 }
 0x5e8   : > { %v952_v59 = vpop.permute.xlu0 %951 }
 0x5e9   : > { %957 = vst.msk [vmem:[#allocation3 + $0x8] sm:$0xff] %vm459_vm3, %v952_v59  ;;  %v953_v6 = vsel %vm475_vm6, %v950_v58, %v952_v59  ;;  %v2207_v58 = vld [vmem:[%s3097_s4 + $0x18] sm:$0xff]  ;;  %v1398_v59 = vld [vmem:[%s3099_s6] sm:$0xff] }
 0x5ea   : > { %v963_v60 = vpop.permute.xlu1 %962 }
 0x5ec   : > { %v965_v61 = vpop.permute.xlu0 %964 }
 0x5ed   : > { %970 = vst.msk [vmem:[#allocation3 + $0x18] sm:$0xff] %vm459_vm3, %v965_v61  ;;  %v966_v2 = vsel %vm489_vm5, %v963_v60, %v965_v61  ;;  %v1399_v60 = vld [vmem:[%s3099_s6 + $0x8] sm:$0xff]  ;;  %v1400_v61 = vld [vmem:[%s3099_s6 + $0x10] sm:$0xff] }
 0x5ee   : > { %v976_v62 = vpop.permute.xlu1 %975  ;;  %v2346_v8 = vpack.c.bf16 %v966_v2, %v953_v6  ;;  %v1404_v6 = vld [vmem:[%s3099_s6 + $0x30] sm:$0xff] }
 0x5f0   : > { %v978_v63 = vpop.permute.xlu0 %977  ;;  %v1063_v4 = vld [vmem:[#allocation3 + $0x8] sm:$0xff] }
 0x5f1   : > { %983 = vst.msk [vmem:[#allocation3 + $0x28] sm:$0xff] %vm459_vm3, %v978_v63  ;;  %v979_v15 = vsel %vm503_vm8, %v976_v62, %v978_v63  ;;  %v2549_v62 = vmov 0.0|0.0   ;;  %v2377_v63 = vpack.c.bf16 %v1399_v60, %v1398_v59 }
 0x5f2   : > { %v989_v0 = vpop.permute.xlu1 %988 }
 0x5f4   : > { %v991_v3 = vpop.permute.xlu0 %990  ;;  %v1065_v5 = vld [vmem:[#allocation3 + $0x18] sm:$0xff] }
 0x5f5   : > { %996 = vst.msk [vmem:[#allocation3 + $0x38] sm:$0xff] %vm459_vm3, %v991_v3  ;;  %v2344_v7 = vpack.c.bf16 %v1065_v5, %v1063_v4  ;;  %v992_v11 = vsel %vm517_vm7, %v989_v0, %v991_v3  ;;  %v1401_v0 = vld [vmem:[%s3099_s6 + $0x18] sm:$0xff]  ;;  %v1402_v3 = vld [vmem:[%s3099_s6 + $0x20] sm:$0xff]  ;;  %v1403_v4 = vld [vmem:[%s3099_s6 + $0x28] sm:$0xff] }
 0x5f6   : > { %v1002_v9 = vpop.permute.xlu1 %1001  ;;  %v2350_v18 = vpack.c.bf16 %v992_v11, %v979_v15  ;;  %v2380_v2 = vpack.c.bf16 %v1401_v0, %v1400_v61  ;;  %v2383_v5 = vpack.c.bf16 %v1403_v4, %v1402_v3  ;;  %v2206_v0 = vld [vmem:[%s3096_s3 + $0x18] sm:$0xff]  ;;  %v1411_v3 = vld [vmem:[%s3099_s6 + $0x68] sm:$0xff] }
 0x5f7   : > { %2345 = vmatprep.subr.bf16.mxu0 %v2344_v7  ;;  %v1405_v7 = vld [vmem:[%s3099_s6 + $0x38] sm:$0xff] }
 0x5f8   : > { %2347 = vmatpush1.bf16.msra.mxu0 %v2346_v8  ;;  %v1004_v10 = vpop.permute.xlu0 %1003  ;;  %v1067_v13 = vld [vmem:[#allocation3 + $0x28] sm:$0xff]  ;;  %v2386_v8 = vpack.c.bf16 %v1405_v7, %v1404_v6 }
 0x5f9   : > { %1009 = vst.msk [vmem:[#allocation3 + $0x48] sm:$0xff] %vm459_vm3, %v1004_v10  ;;  %v1005_v25 = vsel %vm531_vm10, %v1002_v9, %v1004_v10  ;;  %v1406_v9 = vld [vmem:[%s3099_s6 + $0x40] sm:$0xff]  ;;  %v1407_v10 = vld [vmem:[%s3099_s6 + $0x48] sm:$0xff]  ;;  %v1413_v6 = vld [vmem:[%s3099_s6 + $0x78] sm:$0xff] }
 0x5fa   : > { %v1015_v17 = vpop.permute.xlu1 %1014  ;;  %v2389_v11 = vpack.c.bf16 %v1407_v10, %v1406_v9  ;;  %v1415_v9 = vld [vmem:[%s3099_s6 + $0x88] sm:$0xff] }
 0x5fc   : > { %v1017_v12 = vpop.permute.xlu0 %1016  ;;  %v1069_v14 = vld [vmem:[#allocation3 + $0x38] sm:$0xff] }
 0x5fd   : > { %1022 = vst.msk [vmem:[#allocation3 + $0x58] sm:$0xff] %vm459_vm3, %v1017_v12  ;;  %v2348_v16 = vpack.c.bf16 %v1069_v14, %v1067_v13  ;;  %v1018_v20 = vsel %vm545_vm9, %v1015_v17, %v1017_v12  ;;  %v1408_v12 = vld [vmem:[%s3099_s6 + $0x50] sm:$0xff]  ;;  %v1409_v13 = vld [vmem:[%s3099_s6 + $0x58] sm:$0xff] }
 0x5fe   : > { %v1028_v21 = vpop.permute.xlu1 %1027  ;;  %v2354_v27 = vpack.c.bf16 %v1018_v20, %v1005_v25  ;;  %v2392_v14 = vpack.c.bf16 %v1409_v13, %v1408_v12 }
 0x5ff   : > { %2349 = vmatprep.subr.bf16.mxu0 %v2348_v16 }
 0x600   : > { %2351 = vmatpush1.bf16.msra.mxu0 %v2350_v18  ;;  %v1030_v19 = vpop.permute.xlu0 %1029  ;;  %v1071_v23 = vld [vmem:[#allocation3 + $0x48] sm:$0xff] }
 0x601   : > { %1035 = vst.msk [vmem:[#allocation3 + $0x68] sm:$0xff] %vm459_vm3, %v1030_v19  ;;  %v1031_v33 = vsel %vm559_vm12, %v1028_v21, %v1030_v19 }
 0x602   : > { %v1041_v29 = vpop.permute.xlu1 %1040 }
 0x604   : > { %v1043_v22 = vpop.permute.xlu0 %1042  ;;  %v1073_v24 = vld [vmem:[#allocation3 + $0x58] sm:$0xff] }
 0x605   : > { %1048 = vst.msk [vmem:[#allocation3 + $0x78] sm:$0xff] %vm459_vm3, %v1043_v22  ;;  %v2352_v26 = vpack.c.bf16 %v1073_v24, %v1071_v23  ;;  %v1044_v30 = vsel %vm573_vm11, %v1041_v29, %v1043_v22 }
 0x606   : > { %v2358_v35 = vpack.c.bf16 %v1044_v30, %v1031_v33  ;;  %v1054_v37 = vpop.permute.xlu1 %1053 }
 0x607   : > { %2353 = vmatprep.subr.bf16.mxu0 %v2352_v26 }
 0x608   : > { %2355 = vmatpush1.bf16.msra.mxu0 %v2354_v27  ;;  %v1056_v28 = vpop.permute.xlu0 %1055  ;;  %v1075_v31 = vld [vmem:[#allocation3 + $0x68] sm:$0xff] }
 0x609   : > { %1061 = vst.msk [vmem:[#allocation3 + $0x88] sm:$0xff] %vm459_vm3, %v1056_v28  ;;  %v1057_v39 = vsel %vm587_vm13, %v1054_v37, %v1056_v28 }
 0x60c   : > { %v1077_v32 = vld [vmem:[#allocation3 + $0x78] sm:$0xff] }
 0x60d   : > { %v2356_v34 = vpack.c.bf16 %v1077_v32, %v1075_v31 }
 0x60f   : > { %2357 = vmatprep.subr.bf16.mxu0 %v2356_v34 }
 0x610   : > { %2359 = vmatpush1.bf16.msra.mxu0 %v2358_v35  ;;  %v1079_v36 = vld [vmem:[#allocation3 + $0x88] sm:$0xff] }
 0x611   : > { %1104 = vmatprep.subr.mxu0 %v1079_v36 }
 0x614   : > { %1105 = vmatpush1.msra.mxu0 %v1057_v39 }
 0x615   : > { %2205 = vmatmul.mubr.msk.f32.vlgmr.msra.gmra.mrb[2].mxu0 %vm616_vm14, %v2203_v38  ;;  %2376 = vmatprep.subr.bf16.mxu0 %v2549_v62 }
 0x616   : > { %2378 = vmatpush1.bf16.msra.mxu0 %v2377_v63 }
 0x617   : > { %v1083_v40 = vpop.permute.xlu1 %1082  ;;  %2379 = vmatprep.subr.bf16.mxu0 %v2549_v62 }
 0x61a   : > { %2381 = vmatpush1.bf16.msra.mxu0 %v2380_v2  ;;  %v1410_v2 = vld [vmem:[%s3099_s6 + $0x60] sm:$0xff] }
 0x61b   : > { %2382 = vmatprep.subr.bf16.mxu0 %v2549_v62  ;;  %v2395_v4 = vpack.c.bf16 %v1411_v3, %v1410_v2 }
 0x61e   : > { %2384 = vmatpush1.bf16.msra.mxu0 %v2383_v5  ;;  %v1412_v5 = vld [vmem:[%s3099_s6 + $0x70] sm:$0xff] }
 0x61f   : > { %2385 = vmatprep.subr.bf16.mxu0 %v2549_v62  ;;  %v2398_v7 = vpack.c.bf16 %v1413_v6, %v1412_v5 }
 0x622   : > { %2387 = vmatpush1.bf16.msra.mxu0 %v2386_v8  ;;  %v1414_v8 = vld [vmem:[%s3099_s6 + $0x80] sm:$0xff] }
 0x623   : > { %2388 = vmatprep.subr.bf16.mxu0 %v2549_v62  ;;  %v2401_v10 = vpack.c.bf16 %v1415_v9, %v1414_v8 }
 0x626   : > { %2390 = vmatpush1.bf16.msra.mxu0 %v2389_v11  ;;  %v2212_v11 = vld [vmem:[%s3100_s7 + $0x4] sm:$0xf] }
 0x627   : > { %2391 = vmatprep.subr.bf16.mxu0 %v2549_v62 }
 0x62a   : > { %2393 = vmatpush1.bf16.msra.mxu0 %v2392_v14 }
 0x62b   : > { %2394 = vmatprep.subr.bf16.mxu0 %v2549_v62 }
 0x62e   : > { %2396 = vmatpush1.bf16.msra.mxu0 %v2395_v4 }
 0x62f   : > { %2397 = vmatprep.subr.bf16.mxu0 %v2549_v62 }
 0x632   : > { %2399 = vmatpush1.bf16.msra.mxu0 %v2398_v7 }
 0x633   : > { %2400 = vmatprep.subr.bf16.mxu0 %v2549_v62 }
 0x636   : > { %2402 = vmatpush1.bf16.msra.mxu0 %v2401_v10 }
 0x637   : > { %2252 = vmatprep.subr.mxu0 %v2537_v1 }
 0x6e8   : > { %v1154_v42 = vpop.f32.mrb[2].mxu0 }
 0x6e9   : > { %v1155_v43 = vadd.f32 %v1154_v42, %v1083_v40  ;;  %v1156_v44 = vpop.f32.mrb[3].mxu0 }
 0x6ea   : > { %v1157_v46 = vadd.f32 %v1156_v44, %v1083_v40 }
 0x6eb   : > { %v1159_v47 = vmax.f32 %v1155_v43, 0.0 }
 0x6ec   : > { %v1160_v50 = vmax.f32 %v1157_v46, 0.0 }
 0x6ed   : > { %v1161_v51 = vmul.f32 %v1159_v47, %v2691_v41 }
 0x6ee   : > { %v1162_v54 = vmul.f32 %v1160_v50, %v2693_v45 }
 0x6ef   : > { %1169 = vrot.lane.b32.xlu0 %v1161_v51, %s2539_s17 }
 0x6f0   : > { %1171 = vrot.lane.b32.xlu1 %v1162_v54, %s2539_s17 }
 0x761   : > { %v1170_v55 = vpop.permute.xlu0 %1169 }
 0x762   : > { %1176 = vst.msk [vmem:[#allocation2] sm:$0xff] %vm463_vm2, %v1170_v55  ;;  %v1172_v56 = vpop.permute.xlu1 %1171  ;;  %vm2123_vm2 = vcmask 73728  }
 0x763   : > { %v1173_v57 = vsel %vm459_vm3, %v1170_v55, %v1172_v56 }
 0x764   : > { %1177 = vst.msk [vmem:[#allocation2 + $0x8] sm:$0xff] %vm465_vm4, %v1173_v57 }
 0x769   : > { %v1178_v48 = vld [vmem:[#allocation2] sm:$0xff] }
 0x76a   : > { %1182 = vrot.lane.b32.xlu0 %v1178_v48, %s2540_s21 }
 0x76b   : > { %v1179_v49 = vld [vmem:[#allocation2 + $0x8] sm:$0xff] }
 0x76c   : > { %1184 = vrot.lane.b32.xlu1 %v1179_v49, %s2540_s21 }
 0x76e   : > { %1195 = vrot.lane.b32.xlu0 %v1178_v48, %s2541_s22 }
 0x770   : > { %1197 = vrot.lane.b32.xlu1 %v1179_v49, %s2541_s22 }
 0x772   : > { %1208 = vrot.lane.b32.xlu0 %v1178_v48, %s2542_s23 }
 0x774   : > { %1210 = vrot.lane.b32.xlu1 %v1179_v49, %s2542_s23 }
 0x776   : > { %1221 = vrot.lane.b32.xlu0 %v1178_v48, %s2543_s24 }
 0x778   : > { %1223 = vrot.lane.b32.xlu1 %v1179_v49, %s2543_s24  ;;  %s3051_s24 = scalar_lea.hbm %s3102_s9, %s2233_s16 }
 0x77a   : > { %1234 = vrot.lane.b32.xlu0 %v1178_v48, %s2544_s25 }
 0x77c   : > { %1236 = vrot.lane.b32.xlu1 %v1179_v49, %s2544_s25 }
 0x77e   : > { %1247 = vrot.lane.b32.xlu0 %v1178_v48, %s2545_s26 }
 0x780   : > { %1249 = vrot.lane.b32.xlu1 %v1179_v49, %s2545_s26  ;;  %s2551_s26 = smov [#allocation4]  }
 0x782   : > { %1260 = vrot.lane.b32.xlu0 %v1178_v48, %s2546_s27 }
 0x784   : > { %1262 = vrot.lane.b32.xlu1 %v1179_v49, %s2546_s27  ;;  %s2477_s27 = sshll.u32 %s2551_s26, 4  ;;  %s2478_s27 = int_to_ptr.vmem [resolvable:$false] %s2477_s27 }
 0x785   : > { %s2479_s14 = scalar_lea.vmem %s2478_s27, 32 }
 0x786   : > { %1273 = vrot.lane.b32.xlu0 %v1178_v48, %s2547_s28 }
 0x788   : > { %1275 = vrot.lane.b32.xlu1 %v1179_v49, %s2547_s28  ;;  %s323_s28 = sand.u32 1, %s2527_s10  }
 0x789   : > { %s324_s17 = scalar_lea.vmem [#allocation4], %s323_s28  ;;  %s2126_s25 = scalar_lea.sflag [#allocation5], %s323_s28 }
 0x78a   : > { %1286 = vrot.lane.b32.xlu0 %v1178_v48, %s2548_s29  ;;  %s2138_s21 = sshll.u32 %s324_s17, 4  ;;  %s3053_s21 = int_to_ptr.vmem [resolvable:$true] %s2138_s21 }
 0x78b   : > { %s2473_s13 = scalar_lea.vmem %s3053_s21, 16  ;;  %p2480_p0 = scmp.lt.s32.totalorder %s3053_s21, %s2478_s27 }
 0x78c   : > { %1288 = vrot.lane.b32.xlu1 %v1179_v49, %s2548_s29  ;;  %p2474_p11 = scmp.ne.s32.totalorder %s3053_s21, %s2473_s13  ;;  %p2481_p1 = scmp.lt.s32.totalorder %s2479_s14, %s2473_s13 }
 0x78e   : > { %1315 = vperm.xlu0 %2471, %v2207_v58   ;;  %p2475_p12 = pnand %p2474_p11, %p2640_p5  ;;  %p2482_p2 = por %p2481_p1, %p2480_p0 }
 0x790   : > { %p2476_p13 = pneg %p2475_p12 }
 0x792   : > { %p2483_p3 = pnand %p2482_p2, %p2476_p13 }
 0x7dc   : > { %v1183_v15 = vpop.permute.xlu0 %1182 }
 0x7de   : > { %v1185_v16 = vpop.permute.xlu1 %1184 }
 0x7df   : > { %v1186_v17 = vsel %vm475_vm6, %v1183_v15, %v1185_v16  ;;  %1190 = vst.msk [vmem:[#allocation3 + $0x8] sm:$0xff] %vm459_vm3, %v1185_v16 }
 0x7e0   : > { %v1196_v18 = vpop.permute.xlu0 %1195 }
 0x7e2   : > { %v1198_v19 = vpop.permute.xlu1 %1197 }
 0x7e3   : > { %v1199_v20 = vsel %vm489_vm5, %v1196_v18, %v1198_v19  ;;  %1203 = vst.msk [vmem:[#allocation3 + $0x18] sm:$0xff] %vm459_vm3, %v1198_v19 }
 0x7e4   : > { %v1209_v21 = vpop.permute.xlu0 %1208  ;;  %v2362_v31 = vpack.c.bf16 %v1199_v20, %v1186_v17 }
 0x7e6   : > { %v1211_v22 = vpop.permute.xlu1 %1210  ;;  %v1296_v26 = vld [vmem:[#allocation3 + $0x8] sm:$0xff] }
 0x7e7   : > { %v1212_v23 = vsel %vm503_vm8, %v1209_v21, %v1211_v22  ;;  %1216 = vst.msk [vmem:[#allocation3 + $0x28] sm:$0xff] %vm459_vm3, %v1211_v22  ;;  %v1490_v22 = vld [vmem:[%s3100_s7] sm:$0xf] }
 0x7e8   : > { %v1222_v24 = vpop.permute.xlu0 %1221 }
 0x7ea   : > { %v1224_v25 = vpop.permute.xlu1 %1223  ;;  %v1298_v27 = vld [vmem:[#allocation3 + $0x18] sm:$0xff] }
 0x7eb   : > { %v1225_v28 = vsel %vm517_vm7, %v1222_v24, %v1224_v25  ;;  %1229 = vst.msk [vmem:[#allocation3 + $0x38] sm:$0xff] %vm459_vm3, %v1224_v25  ;;  %v2360_v29 = vpack.c.bf16 %v1298_v27, %v1296_v26  ;;  %v2218_v24 = vld [vmem:[%s3100_s7 + $0xc] sm:$0xf]  ;;  %v2221_v26 = vld [vmem:[%s3100_s7 + $0x10] sm:$0xf] }
 0x7ec   : > { %v1235_v30 = vpop.permute.xlu0 %1234  ;;  %v2366_v42 = vpack.c.bf16 %v1225_v28, %v1212_v23  ;;  %v2224_v28 = vld [vmem:[%s3100_s7 + $0x14] sm:$0xf] }
 0x7ed   : > { %2361 = vmatprep.subr.bf16.mxu1 %v2360_v29 }
 0x7ee   : > { %2363 = vmatpush1.bf16.msra.mxu1 %v2362_v31  ;;  %v1237_v32 = vpop.permute.xlu1 %1236  ;;  %v1300_v36 = vld [vmem:[#allocation3 + $0x28] sm:$0xff] }
 0x7ef   : > { %v1238_v33 = vsel %vm531_vm10, %v1235_v30, %v1237_v32  ;;  %1242 = vst.msk [vmem:[#allocation3 + $0x48] sm:$0xff] %vm459_vm3, %v1237_v32  ;;  %v2227_v30 = vld [vmem:[%s3100_s7 + $0x18] sm:$0xf]  ;;  %v2230_v32 = vld [vmem:[%s3100_s7 + $0x1c] sm:$0xf] }
 0x7f0   : > { %v1248_v34 = vpop.permute.xlu0 %1247 }
 0x7f2   : > { %v1250_v35 = vpop.permute.xlu1 %1249  ;;  %v1302_v37 = vld [vmem:[#allocation3 + $0x38] sm:$0xff] }
 0x7f3   : > { %v1251_v38 = vsel %vm545_vm9, %v1248_v34, %v1250_v35  ;;  %1255 = vst.msk [vmem:[#allocation3 + $0x58] sm:$0xff] %vm459_vm3, %v1250_v35  ;;  %v2364_v39 = vpack.c.bf16 %v1302_v37, %v1300_v36  ;;  %v1489_v36 = vld [vmem:[%s3101_s8] sm:$0x1] }
 0x7f4   : > { %v1261_v40 = vpop.permute.xlu0 %1260  ;;  %v2370_v56 = vpack.c.bf16 %v1251_v38, %v1238_v33 }
 0x7f5   : > { %2365 = vmatprep.subr.bf16.mxu1 %v2364_v39 }
 0x7f6   : > { %2367 = vmatpush1.bf16.msra.mxu1 %v2366_v42  ;;  %v1263_v43 = vpop.permute.xlu1 %1262  ;;  %v1304_v50 = vld [vmem:[#allocation3 + $0x48] sm:$0xff] }
 0x7f7   : > { %v1264_v44 = vsel %vm559_vm12, %v1261_v40, %v1263_v43  ;;  %1268 = vst.msk [vmem:[#allocation3 + $0x68] sm:$0xff] %vm459_vm3, %v1263_v43 }
 0x7f8   : > { %v1274_v46 = vpop.permute.xlu0 %1273 }
 0x7fa   : > { %v1276_v47 = vpop.permute.xlu1 %1275  ;;  %v1306_v51 = vld [vmem:[#allocation3 + $0x58] sm:$0xff] }
 0x7fb   : > { %v1277_v54 = vsel %vm573_vm11, %v1274_v46, %v1276_v47  ;;  %1281 = vst.msk [vmem:[#allocation3 + $0x78] sm:$0xff] %vm459_vm3, %v1276_v47  ;;  %v2368_v55 = vpack.c.bf16 %v1306_v51, %v1304_v50 }
 0x7fc   : > { %v1287_v57 = vpop.permute.xlu0 %1286  ;;  %v2374_v61 = vpack.c.bf16 %v1277_v54, %v1264_v44 }
 0x7fd   : > { %2369 = vmatprep.subr.bf16.mxu1 %v2368_v55 }
 0x7fe   : > { %2371 = vmatpush1.bf16.msra.mxu1 %v2370_v56  ;;  %v1289_v48 = vpop.permute.xlu1 %1288  ;;  %v1308_v58 = vld [vmem:[#allocation3 + $0x68] sm:$0xff] }
 0x7ff   : > { %v1290_v49 = vsel %vm587_vm13, %v1287_v57, %v1289_v48  ;;  %1294 = vst.msk [vmem:[#allocation3 + $0x88] sm:$0xff] %vm459_vm3, %v1289_v48 }
 0x802   : > { %v1310_v59 = vld [vmem:[#allocation3 + $0x78] sm:$0xff] }
 0x803   : > { %v2372_v60 = vpack.c.bf16 %v1310_v59, %v1308_v58 }
 0x805   : > { %2373 = vmatprep.subr.bf16.mxu1 %v2372_v60 }
 0x806   : > { %2375 = vmatpush1.bf16.msra.mxu1 %v2374_v61  ;;  %v1312_v63 = vld [vmem:[#allocation3 + $0x88] sm:$0xff] }
 0x807   : > { %1337 = vmatprep.subr.mxu1 %v1312_v63 }
 0x80a   : > { %1338 = vmatpush1.msra.mxu1 %v1290_v49 }
 0x80b   : > { %2208 = vmatmul.mubr.msk.f32.vlgmr.msra.gmra.mrb[4].mxu1 %vm616_vm14, %v2206_v0  ;;  %2257 = vmatprep.subr.mxu1 %v2537_v1 }
 0x80c   : > { %2258 = vmatpush3.msk.msra.mxu1 %vm1495_vm15, %v2212_v11  ;;  %2259 = vmatprep.mubr.msk.f32.mxu1 %vm2550_vm0, %v2537_v1 }
 0x80d   : > { %2262 = vmatprep.subr.mxu1 %v2537_v1  ;;  %v1316_v62 = vpop.permute.xlu0 %1315 }
 0x8de   : > { %v1387_v12 = vpop.f32.mrb[4].mxu1 }
 0x8df   : > { %v1388_v13 = vadd.f32 %v1387_v12, %v1316_v62  ;;  %v1389_v14 = vpop.f32.mrb[5].mxu1 }
 0x8e0   : > { %v1390_v15 = vadd.f32 %v1389_v14, %v1316_v62 }
 0x8e1   : > { %v1392_v16 = vmul.f32 %v1388_v13, %v2691_v41 }
 0x8e2   : > { %v1393_v17 = vmul.f32 %v1390_v15, %v2693_v45 }
 0x8e3   : > { %v1394_v18 = vmul.f32 0.5, %v1392_v16 }
 0x8e4   : > { %v1395_v19 = vmul.f32 0.5, %v1393_v17 }
 0x8e5   : > { %v1396_v21 = vadd.f32 %v1394_v18, %v2806_v52 }
 0x8e6   : > { %v1397_v20 = vadd.f32 %v1395_v19, %v2809_v53  ;;  %v2215_v53 = vld [vmem:[%s3100_s7 + $0x8] sm:$0xf] }
 0x8e8   : > { %2209 = vmatprep.mubr.msk.f32.mxu0 %vm459_vm3, %v1397_v20 }
 0x8e9   : > { %1484 = vmatmul.mubr.f32.vlgmr.msra.gmra.mrb[4].mxu0 %v1396_v21 }
 0x8ea   : > { %2253 = vmatpush3.msk.msra.mxu0 %vm1495_vm15, %v1490_v22  ;;  %2254 = vmatprep.mubr.msk.f32.mxu0 %vm2550_vm0, %v2537_v1 }
 0x9bc   : > { %v1485_v41 = vpop.f32.mrb[4].mxu0 }
 0x9bd   : > { %v1487_v45 = vpop.f32.mrb[5].mxu0  ;;  %2255 = vmatmul.mubr.msk.f32.vlgmr.msra.gmra.mrb[6].mxu0 %vm1491_vm1, %v1485_v41  ;;  %v1572_v52 = vrot.slane %v1485_v41, 1  ;;  %v1651_v23 = vrot.slane %v1485_v41, 2  ;;  %v1730_v25 = vrot.slane %v1485_v41, 3  ;;  %v1809_v27 = vrot.slane %v1485_v41, 4 }
 0x9be   : > { %v1888_v29 = vrot.slane %v1485_v41, 5  ;;  %v1967_v31 = vrot.slane %v1485_v41, 6  ;;  %v2046_v33 = vrot.slane %v1485_v41, 7 }
 0x9bf   : > { %2260 = vmatmul.mubr.msk.f32.vlgmr.msra.gmra.mrb[6].mxu1 %vm1491_vm1, %v1572_v52 }
 0x9c0   : > { %2263 = vmatpush3.msk.msra.mxu1 %vm1495_vm15, %v2215_v53  ;;  %2264 = vmatprep.mubr.msk.f32.mxu1 %vm2550_vm0, %v2537_v1 }
 0x9c1   : > { %2267 = vmatprep.subr.mxu1 %v2537_v1 }
 0x9c7   : > { %2265 = vmatmul.mubr.msk.f32.vlgmr.msra.gmra.mrb[6].mxu1 %vm1491_vm1, %v1651_v23 }
 0x9c8   : > { %2268 = vmatpush3.msk.msra.mxu1 %vm1495_vm15, %v2218_v24  ;;  %2269 = vmatprep.mubr.msk.f32.mxu1 %vm2550_vm0, %v2537_v1 }
 0x9c9   : > { %2272 = vmatprep.subr.mxu1 %v2537_v1 }
 0x9cf   : > { %2270 = vmatmul.mubr.msk.f32.vlgmr.msra.gmra.mrb[6].mxu1 %vm1491_vm1, %v1730_v25 }
 0x9d0   : > { %2273 = vmatpush3.msk.msra.mxu1 %vm1495_vm15, %v2221_v26  ;;  %2274 = vmatprep.mubr.msk.f32.mxu1 %vm2550_vm0, %v2537_v1 }
 0x9d1   : > { %2277 = vmatprep.subr.mxu1 %v2537_v1 }
 0x9d7   : > { %2275 = vmatmul.mubr.msk.f32.vlgmr.msra.gmra.mrb[6].mxu1 %vm1491_vm1, %v1809_v27 }
 0x9d8   : > { %2278 = vmatpush3.msk.msra.mxu1 %vm1495_vm15, %v2224_v28  ;;  %2279 = vmatprep.mubr.msk.f32.mxu1 %vm2550_vm0, %v2537_v1 }
 0x9d9   : > { %2282 = vmatprep.subr.mxu1 %v2537_v1 }
 0x9df   : > { %2280 = vmatmul.mubr.msk.f32.vlgmr.msra.gmra.mrb[6].mxu1 %vm1491_vm1, %v1888_v29 }
 0x9e0   : > { %2283 = vmatpush3.msk.msra.mxu1 %vm1495_vm15, %v2227_v30  ;;  %2284 = vmatprep.mubr.msk.f32.mxu1 %vm2550_vm0, %v2537_v1 }
 0x9e1   : > { %2287 = vmatprep.subr.mxu1 %v2537_v1 }
 0x9e7   : > { %2285 = vmatmul.mubr.msk.f32.vlgmr.msra.gmra.mrb[6].mxu1 %vm1491_vm1, %v1967_v31 }
 0x9e8   : > { %2288 = vmatpush3.msk.msra.mxu1 %vm1495_vm15, %v2230_v32  ;;  %2289 = vmatprep.mubr.msk.f32.mxu1 %vm2550_vm0, %v2537_v1 }
 0x9ef   : > { %2290 = vmatmul.mubr.msk.f32.vlgmr.msra.gmra.mrb[6].mxu1 %vm1491_vm1, %v2046_v33 }
 0xa90   : > { %v1565_v34 = vpop.f32.mrb[6].mxu0 }
 0xa91   : > { %v2256_v35 = vpop.f32.mrb[7].mxu0  ;;  %v1569_v37 = vadd.f32 %v1565_v34, %v1489_v36 }
 0xac2   : > { %v2118_v38 = vpop.f32.mrb[6].mxu1 }
 0xac3   : > { %v2404_v39 = vadd.f32 %v2118_v38, %v1569_v37  ;;  %v2291_v40 = vpop.f32.mrb[7].mxu1 }
 0xac5   : > { %2124 = vst.msk [vmem:[%s324_s17] sm:$0x1] %vm2123_vm2, %v2404_v39 }
 0xac6   : > { %2486 = shalt.err (!%p2483_p3)
}
 0xac7   : > { %s2487_s28 = scalar_lea.hbm %s3051_s24, 16  ;;  %s2491_s17 = scalar_lea.hbm %s3102_s9, 32 }
 0xac8   : > { %p2488_p4 = scmp.ne.s32.totalorder %s3051_s24, %s2487_s28  ;;  %p2492_p9 = scmp.lt.u32.totalorder %s3051_s24, %s3102_s9 }
 0xac9   : > { %p2493_p10 = scmp.lt.u32.totalorder %s2491_s17, %s2487_s28  ;;  %p2495_p12 = scmp.lt.u32.totalorder %s2487_s28, %s3051_s24 }
 0xaca   : > { %p2489_p7 = pnand %p2488_p4, %p2640_p5 }
 0xacb   : > { %p2494_p11 = por %p2493_p10, %p2492_p9 }
 0xacc   : > { %p2490_p8 = pneg %p2489_p7 }
 0xacd   : > { %p2496_p13 = por %p2495_p12, %p2494_p11 }
 0xacf   : > { %p2497_p0 = pnand %p2496_p13, %p2490_p8 }
 0xad1   : > { %2500 = shalt.err (!%p2497_p0)
}
 0xad2   : > { %2418 = dma.vmem_to_hbm [thread:$0]  (%p2640_p5), %s3053_s21, 16, %s3051_s24, %s2126_s25  }
 0xad3 PF: > { %p2424_p1 = scmp.ge.s32.totalorder %s2535_s12, 2  ;;  %s2150_s13 = sand.u32 1, %s2523_s30  }
 0xad4   : > { %s2151_s26 = scalar_lea.sflag [#allocation5], %s2150_s13 }
 0xad5   : > { %p2421_p2 = pnand %p2424_p1, %p2644_p6 }
 0xad7   : > { %2518 = dma.done.wait (!%p2421_p2), %s2151_s26, 16  }
 0xad8   : > { %2520 = vsyncadd (!%p2421_p2), %s2151_s26, 4294967280  ;;  %p19_p3 = scmp.ge.s32.totalorder %s2627_s15, 4   ;;  %s3105_s30 = smov %s2527_s10 }
 0xad9   : > { %s3106_s10 = smov %s2531_s11  ;;  %s3107_s11 = smov %s2638_s18 }
 0xada   : > { %s3108_s12 = smov %s2627_s15  ;;  %21 = sbr.rel (!%p19_p3) target bundleno = 3 (0x3), region = 104 }
 0xae1   :  { %2155 = vsyncpa [#allocation5], 1 }
 0xae2   :  { %2157 = vsyncpa [#allocation5 + $0x1], 1 }

</bundles_post_ra>
